<compile_context>
chip_gen: v7x
topology: tpu7x:2x2x1
jax: 0.10.0
libtpu: 0.0.40
codegen_flags: <defaults>
</compile_context>

<pallas_src>
import functools

import jax
import jax.numpy as jnp
from jax.experimental import pallas as pl
from jax.experimental.pallas import tpu as pltpu


def _stable_softmax(x):
    m = jnp.max(x, axis=-1, keepdims=True)
    e = jnp.exp(x - m)
    # EUP reciprocal + VPU multiply instead of a VALU divide sequence.
    return e * pl.reciprocal(jnp.sum(e, axis=-1, keepdims=True), approx=True)


def _layer_norm(x, gamma, beta, eps=1e-5):
    mu = jnp.mean(x, axis=-1, keepdims=True)
    var = jnp.mean(jnp.square(x - mu), axis=-1, keepdims=True)
    return (x - mu) * jax.lax.rsqrt(var + eps) * gamma + beta


def ssoc_forward_kernel(
    # scalars (SMEM)
    tem_ref, step_ref,
    # backbone stand-in (GAP already done outside)
    gap_ref, w_bb_ref, b_bb_ref,
    # cluster centers
    center_ref,
    # transformer encoder params (stacked over layers, lane-dense / head-fused)
    wq_ref, bq_ref, wkv_ref, bkv_ref, wo_ref, bo_ref,
    ln1_g_ref, ln1_b_ref,
    w1_ref, b1_ref, w2_ref, b2_ref,
    ln2_g_ref, ln2_b_ref,
    # outputs
    cos_ref, prob_ref, feat_ref, center_out_ref,
    *, n_layers, n_heads, head_dim,
):
    f32 = jnp.float32
    hd = n_heads * head_dim

    # Hoist the scalar SMEM reads before any VMEM stores / vector work so the
    # sst->sld forwarding path stays intact.
    inv_tem = 1.0 / tem_ref[step_ref[0]]

    # ---------- backbone stand-in: linear projection of the GAP features ----------
    feature = (
        jnp.dot(gap_ref[...], w_bb_ref[...], preferred_element_type=f32)
        + b_bb_ref[...]
    )                                                  # (B, D)

    # ---------- transformer encoder: centers cross-attend over batch features ----
    center = center_ref[...]                           # (C, D)
    scale = 1.0 / (float(head_dim) ** 0.5)
    for l in range(n_layers):
        # fused head projections: one matmul for Q, one for the K|V concat
        q = jnp.dot(center, wq_ref[l], preferred_element_type=f32) + bq_ref[l]      # (C, NH*dh)
        kv = jnp.dot(feature, wkv_ref[l], preferred_element_type=f32) + bkv_ref[l]  # (B, 2*NH*dh)
        k = kv[:, :hd]                                  # (B, NH*dh)
        v = kv[:, hd:]                                  # (B, NH*dh)

        # per-head score / softmax / PV on static lane slices
        outs = []
        for h in range(n_heads):
            lo = h * head_dim
            hi = lo + head_dim
            s = jax.lax.dot_general(
                q[:, lo:hi], k[:, lo:hi],
                (((1,), (1,)), ((), ())),
                preferred_element_type=f32) * scale     # (C, B)
            p = _stable_softmax(s)
            outs.append(jnp.dot(p, v[:, lo:hi], preferred_element_type=f32))  # (C, dh)

        # stack heads along lane axis -> single lane-dense output projection
        o = jnp.concatenate(outs, axis=-1)               # (C, NH*dh)
        attn_out = jnp.dot(o, wo_ref[l], preferred_element_type=f32) + bo_ref[l]
        center = _layer_norm(center + attn_out, ln1_g_ref[l], ln1_b_ref[l])

        hmid = jnp.maximum(
            jnp.dot(center, w1_ref[l], preferred_element_type=f32) + b1_ref[l], 0.0)
        ffn = jnp.dot(hmid, w2_ref[l], preferred_element_type=f32) + b2_ref[l]
        center = _layer_norm(center + ffn, ln2_g_ref[l], ln2_b_ref[l])

    # ---------- head: cos = feature @ center_new^T / tem[step]; prob = softmax ----
    cos = jax.lax.dot_general(
        feature, center, (((1,), (1,)), ((), ())),
        preferred_element_type=f32) * inv_tem            # (B, C)

    # writes last
    feat_ref[...] = feature
    center_out_ref[...] = center
    cos_ref[...] = cos
    prob_ref[...] = _stable_softmax(cos)


def make_params(key, cin, d_model, n_layers, n_heads):
    """Parameters stored lane-dense: heads fused along the last (lane) axis."""
    dh = d_model // n_heads
    hd = n_heads * dh
    dff = 4 * d_model
    ks = jax.random.split(key, 8)
    w = lambda k, shape: (0.05 * jax.random.normal(k, shape)).astype(jnp.float32)
    return dict(
        w_bb=w(ks[0], (cin, d_model)),
        b_bb=jnp.zeros((1, d_model), jnp.float32),
        # Q projection: (L, D, NH*dh); K|V concatenated: (L, D, 2*NH*dh)
        wq=w(ks[1], (n_layers, d_model, hd)),
        bq=jnp.zeros((n_layers, 1, hd), jnp.float32),
        wkv=w(ks[2], (n_layers, d_model, 2 * hd)),
        bkv=jnp.zeros((n_layers, 1, 2 * hd), jnp.float32),
        # output projection: (L, NH*dh, D)
        wo=w(ks[3], (n_layers, hd, d_model)),
        bo=jnp.zeros((n_layers, 1, d_model), jnp.float32),
        ln1_g=jnp.ones((n_layers, 1, d_model), jnp.float32),
        ln1_b=jnp.zeros((n_layers, 1, d_model), jnp.float32),
        w1=w(ks[4], (n_layers, d_model, dff)),
        b1=jnp.zeros((n_layers, 1, dff), jnp.float32),
        w2=w(ks[5], (n_layers, dff, d_model)),
        b2=jnp.zeros((n_layers, 1, d_model), jnp.float32),
        ln2_g=jnp.ones((n_layers, 1, d_model), jnp.float32),
        ln2_b=jnp.zeros((n_layers, 1, d_model), jnp.float32),
    )


def ssoc_forward(x, center, step, tem, params, *, n_heads):
    B, Cin, H, W = x.shape
    C, D = center.shape
    L, _, hd = params["wq"].shape
    dh = hd // n_heads

    # Backbone GAP done in XLA: shrinks kernel input from (B, Cin, H*W) to (B, Cin)
    # and removes the in-kernel XLU reduce over a padded tile.
    gap = jnp.mean(x.reshape(B, Cin, H * W), axis=-1)   # (B, Cin)

    smem = pl.BlockSpec(memory_space=pltpu.MemorySpace.SMEM)
    vmem = pl.BlockSpec(memory_space=pltpu.MemorySpace.VMEM)

    kernel = functools.partial(
        ssoc_forward_kernel, n_layers=L, n_heads=n_heads, head_dim=dh)

    out_shape = (
        jax.ShapeDtypeStruct((B, C), jnp.float32),   # cos
        jax.ShapeDtypeStruct((B, C), jnp.float32),   # prob
        jax.ShapeDtypeStruct((B, D), jnp.float32),   # feature
        jax.ShapeDtypeStruct((C, D), jnp.float32),   # center_new
    )

    # 20 inputs total: 2 scalar tables in SMEM + 18 VMEM-resident tensors.
    # All tensors are tiny -> single invocation (no grid), whole arrays resident
    # in VMEM, scalars (temperature table + step index) in SMEM.
    # TODO(synk): at real ResNet-scale d_model (~2048) switch to a gridded /
    #   emit_pipeline design with weights in HBM (v7x has only 64 MiB VMEM).
    return pl.pallas_call(
        kernel,
        out_shape=out_shape,
        in_specs=[smem, smem] + [vmem] * 18,
        out_specs=(vmem, vmem, vmem, vmem),
    )(
        tem, jnp.array([step], jnp.int32),
        gap, params["w_bb"], params["b_bb"], center,
        params["wq"], params["bq"], params["wkv"], params["bkv"],
        params["wo"], params["bo"],
        params["ln1_g"], params["ln1_b"],
        params["w1"], params["b1"], params["w2"], params["b2"],
        params["ln2_g"], params["ln2_b"],
    )


if __name__ == "__main__":
    key = jax.random.PRNGKey(0)
    k_x, k_c, k_p = jax.random.split(key, 3)

    # small shapes implied by the module: batch, 3-channel images, spatial=16,
    # feature_dim=32, num_class=8, n_layers=2, n_heads=4.
    B, Cin, H, W = 8, 3, 16, 16
    D, C = 32, 8
    L, NH = 2, 4

    x = jax.random.normal(k_x, (B, Cin, H, W), jnp.float32)
    center = jax.random.normal(k_c, (C, D), jnp.float32)
    tem = jnp.full((B,), 0.5, jnp.float32)      # self.tem = full((batch_size,), args.tem)
    step = 3                                    # must be < len(tem)

    params = make_params(k_p, Cin, D, L, NH)

    cos, prob, feature, center_new = ssoc_forward(
        x, center, step, tem, params, n_heads=NH)
    jax.block_until_ready((cos, prob, feature, center_new))

    assert cos.shape == (B, C) and prob.shape == (B, C)
    assert feature.shape == (B, D) and center_new.shape == (C, D)
    print("KERNEL_OK")
</pallas_src>

<mosaic_0001>
module attributes {stable_mosaic.version = 11 : i64} {
  func.func @ssoc_forward_kernel(%arg0: memref<8xf32, #tpu.memory_space<smem>>, %arg1: memref<1xi32, #tpu.memory_space<smem>>, %arg2: memref<8x3xf32, #tpu.memory_space<vmem>>, %arg3: memref<3x32xf32, #tpu.memory_space<vmem>>, %arg4: memref<1x32xf32, #tpu.memory_space<vmem>>, %arg5: memref<8x32xf32, #tpu.memory_space<vmem>>, %arg6: memref<2x32x32xf32, #tpu.memory_space<vmem>>, %arg7: memref<2x1x32xf32, #tpu.memory_space<vmem>>, %arg8: memref<2x32x64xf32, #tpu.memory_space<vmem>>, %arg9: memref<2x1x64xf32, #tpu.memory_space<vmem>>, %arg10: memref<2x32x32xf32, #tpu.memory_space<vmem>>, %arg11: memref<2x1x32xf32, #tpu.memory_space<vmem>>, %arg12: memref<2x1x32xf32, #tpu.memory_space<vmem>>, %arg13: memref<2x1x32xf32, #tpu.memory_space<vmem>>, %arg14: memref<2x32x128xf32, #tpu.memory_space<vmem>>, %arg15: memref<2x1x128xf32, #tpu.memory_space<vmem>>, %arg16: memref<2x128x32xf32, #tpu.memory_space<vmem>>, %arg17: memref<2x1x32xf32, #tpu.memory_space<vmem>>, %arg18: memref<2x1x32xf32, #tpu.memory_space<vmem>>, %arg19: memref<2x1x32xf32, #tpu.memory_space<vmem>>, %arg20: memref<8x8xf32, #tpu.memory_space<vmem>>, %arg21: memref<8x8xf32, #tpu.memory_space<vmem>>, %arg22: memref<8x32xf32, #tpu.memory_space<vmem>>, %arg23: memref<8x32xf32, #tpu.memory_space<vmem>>) attributes {dimension_semantics = [], scalar_prefetch = 0 : i64, scratch_operands = 0 : i64, tpu.core_type = #tpu.core_type<tc>} {
    %c0 = arith.constant 0 : index
    %0 = memref.load %arg1[%c0] : memref<1xi32, #tpu.memory_space<smem>>
    %1 = arith.index_cast %0 : i32 to index
    %2 = memref.load %arg0[%1] : memref<8xf32, #tpu.memory_space<smem>>
    %cst = arith.constant 1.000000e+00 : f32
    %3 = arith.divf %cst, %2 : f32
    %c0_0 = arith.constant 0 : index
    %c0_1 = arith.constant 0 : index
    %4 = vector.load %arg2[%c0_0, %c0_1] : memref<8x3xf32, #tpu.memory_space<vmem>>, vector<8x3xf32>
    %c0_2 = arith.constant 0 : index
    %c0_3 = arith.constant 0 : index
    %5 = vector.load %arg3[%c0_2, %c0_3] : memref<3x32xf32, #tpu.memory_space<vmem>>, vector<3x32xf32>
    %cst_4 = arith.constant dense<0.000000e+00> : vector<8x32xf32>
    %6 = tpu.matmul %4, %5, %cst_4 {dimension_numbers = #tpu.dot_dimension_numbers<[1], [0], [0], [1], [0, 0, 1, 1], [], []>} : vector<8x3xf32>, vector<3x32xf32>, vector<8x32xf32> -> vector<8x32xf32>
    %c0_5 = arith.constant 0 : index
    %c0_6 = arith.constant 0 : index
    %7 = vector.load %arg4[%c0_5, %c0_6] : memref<1x32xf32, #tpu.memory_space<vmem>>, vector<1x32xf32>
    %8 = vector.broadcast %7 : vector<1x32xf32> to vector<8x32xf32>
    %9 = arith.addf %6, %8 : vector<8x32xf32>
    %c0_7 = arith.constant 0 : index
    %c0_8 = arith.constant 0 : index
    %10 = vector.load %arg5[%c0_7, %c0_8] : memref<8x32xf32, #tpu.memory_space<vmem>>, vector<8x32xf32>
    %c0_9 = arith.constant 0 : index
    %c0_10 = arith.constant 0 : index
    %c0_11 = arith.constant 0 : index
    %11 = vector.load %arg6[%c0_9, %c0_10, %c0_11] : memref<2x32x32xf32, #tpu.memory_space<vmem>>, vector<1x32x32xf32>
    %12 = vector.shape_cast %11 : vector<1x32x32xf32> to vector<32x32xf32>
    %cst_12 = arith.constant dense<0.000000e+00> : vector<8x32xf32>
    %13 = tpu.matmul %10, %12, %cst_12 {dimension_numbers = #tpu.dot_dimension_numbers<[1], [0], [0], [1], [0, 0, 1, 1], [], []>} : vector<8x32xf32>, vector<32x32xf32>, vector<8x32xf32> -> vector<8x32xf32>
    %c0_13 = arith.constant 0 : index
    %c0_14 = arith.constant 0 : index
    %c0_15 = arith.constant 0 : index
    %14 = vector.load %arg7[%c0_13, %c0_14, %c0_15] : memref<2x1x32xf32, #tpu.memory_space<vmem>>, vector<1x1x32xf32>
    %15 = vector.shape_cast %14 : vector<1x1x32xf32> to vector<1x32xf32>
    %16 = vector.broadcast %15 : vector<1x32xf32> to vector<8x32xf32>
    %17 = arith.addf %13, %16 : vector<8x32xf32>
    %c0_16 = arith.constant 0 : index
    %c0_17 = arith.constant 0 : index
    %c0_18 = arith.constant 0 : index
    %18 = vector.load %arg8[%c0_16, %c0_17, %c0_18] : memref<2x32x64xf32, #tpu.memory_space<vmem>>, vector<1x32x64xf32>
    %19 = vector.shape_cast %18 : vector<1x32x64xf32> to vector<32x64xf32>
    %cst_19 = arith.constant dense<0.000000e+00> : vector<8x64xf32>
    %20 = tpu.matmul %9, %19, %cst_19 {dimension_numbers = #tpu.dot_dimension_numbers<[1], [0], [0], [1], [0, 0, 1, 1], [], []>} : vector<8x32xf32>, vector<32x64xf32>, vector<8x64xf32> -> vector<8x64xf32>
    %c0_20 = arith.constant 0 : index
    %c0_21 = arith.constant 0 : index
    %c0_22 = arith.constant 0 : index
    %21 = vector.load %arg9[%c0_20, %c0_21, %c0_22] : memref<2x1x64xf32, #tpu.memory_space<vmem>>, vector<1x1x64xf32>
    %22 = vector.shape_cast %21 : vector<1x1x64xf32> to vector<1x64xf32>
    %23 = vector.broadcast %22 : vector<1x64xf32> to vector<8x64xf32>
    %24 = arith.addf %20, %23 : vector<8x64xf32>
    %25 = vector.extract_strided_slice %24 {offsets = [0, 0], sizes = [8, 32], strides = [1, 1]} : vector<8x64xf32> to vector<8x32xf32>
    %26 = vector.extract_strided_slice %24 {offsets = [0, 32], sizes = [8, 32], strides = [1, 1]} : vector<8x64xf32> to vector<8x32xf32>
    %27 = vector.extract_strided_slice %17 {offsets = [0, 0], sizes = [8, 8], strides = [1, 1]} : vector<8x32xf32> to vector<8x8xf32>
    %28 = vector.extract_strided_slice %25 {offsets = [0, 0], sizes = [8, 8], strides = [1, 1]} : vector<8x32xf32> to vector<8x8xf32>
    %cst_23 = arith.constant dense<0.000000e+00> : vector<8x8xf32>
    %29 = tpu.matmul %27, %28, %cst_23 {dimension_numbers = #tpu.dot_dimension_numbers<[1], [1], [0], [0], [0, 0, 1, 0], [], []>} : vector<8x8xf32>, vector<8x8xf32>, vector<8x8xf32> -> vector<8x8xf32>
    %cst_24 = arith.constant 0.353553385 : f32
    %30 = vector.broadcast %cst_24 : f32 to vector<8x8xf32>
    %31 = arith.mulf %29, %30 : vector<8x8xf32>
    %cst_25 = arith.constant dense<0xFF800000> : vector<8xf32>
    %32 = vector.multi_reduction <maximumf>, %31, %cst_25 [1] : vector<8x8xf32> to vector<8xf32>
    %33 = vector.shape_cast %32 : vector<8xf32> to vector<8x1xf32>
    %34 = vector.broadcast %33 : vector<8x1xf32> to vector<8x8xf32>
    %35 = arith.subf %31, %34 : vector<8x8xf32>
    %36 = math.exp %35 : vector<8x8xf32>
    %cst_26 = arith.constant dense<0.000000e+00> : vector<8xf32>
    %37 = vector.multi_reduction <add>, %36, %cst_26 [1] : vector<8x8xf32> to vector<8xf32>
    %38 = vector.shape_cast %37 : vector<8xf32> to vector<8x1xf32>
    %39 = tpu.reciprocal %38 {approx = true} : vector<8x1xf32> -> vector<8x1xf32>
    %40 = vector.broadcast %39 : vector<8x1xf32> to vector<8x8xf32>
    %41 = arith.mulf %36, %40 : vector<8x8xf32>
    %42 = vector.extract_strided_slice %26 {offsets = [0, 0], sizes = [8, 8], strides = [1, 1]} : vector<8x32xf32> to vector<8x8xf32>
    %cst_27 = arith.constant dense<0.000000e+00> : vector<8x8xf32>
    %43 = tpu.matmul %41, %42, %cst_27 {dimension_numbers = #tpu.dot_dimension_numbers<[1], [0], [0], [1], [0, 0, 1, 1], [], []>} : vector<8x8xf32>, vector<8x8xf32>, vector<8x8xf32> -> vector<8x8xf32>
    %44 = vector.extract_strided_slice %17 {offsets = [0, 8], sizes = [8, 8], strides = [1, 1]} : vector<8x32xf32> to vector<8x8xf32>
    %45 = vector.extract_strided_slice %25 {offsets = [0, 8], sizes = [8, 8], strides = [1, 1]} : vector<8x32xf32> to vector<8x8xf32>
    %cst_28 = arith.constant dense<0.000000e+00> : vector<8x8xf32>
    %46 = tpu.matmul %44, %45, %cst_28 {dimension_numbers = #tpu.dot_dimension_numbers<[1], [1], [0], [0], [0, 0, 1, 0], [], []>} : vector<8x8xf32>, vector<8x8xf32>, vector<8x8xf32> -> vector<8x8xf32>
    %cst_29 = arith.constant 0.353553385 : f32
    %47 = vector.broadcast %cst_29 : f32 to vector<8x8xf32>
    %48 = arith.mulf %46, %47 : vector<8x8xf32>
    %cst_30 = arith.constant dense<0xFF800000> : vector<8xf32>
    %49 = vector.multi_reduction <maximumf>, %48, %cst_30 [1] : vector<8x8xf32> to vector<8xf32>
    %50 = vector.shape_cast %49 : vector<8xf32> to vector<8x1xf32>
    %51 = vector.broadcast %50 : vector<8x1xf32> to vector<8x8xf32>
    %52 = arith.subf %48, %51 : vector<8x8xf32>
    %53 = math.exp %52 : vector<8x8xf32>
    %cst_31 = arith.constant dense<0.000000e+00> : vector<8xf32>
    %54 = vector.multi_reduction <add>, %53, %cst_31 [1] : vector<8x8xf32> to vector<8xf32>
    %55 = vector.shape_cast %54 : vector<8xf32> to vector<8x1xf32>
    %56 = tpu.reciprocal %55 {approx = true} : vector<8x1xf32> -> vector<8x1xf32>
    %57 = vector.broadcast %56 : vector<8x1xf32> to vector<8x8xf32>
    %58 = arith.mulf %53, %57 : vector<8x8xf32>
    %59 = vector.extract_strided_slice %26 {offsets = [0, 8], sizes = [8, 8], strides = [1, 1]} : vector<8x32xf32> to vector<8x8xf32>
    %cst_32 = arith.constant dense<0.000000e+00> : vector<8x8xf32>
    %60 = tpu.matmul %58, %59, %cst_32 {dimension_numbers = #tpu.dot_dimension_numbers<[1], [0], [0], [1], [0, 0, 1, 1], [], []>} : vector<8x8xf32>, vector<8x8xf32>, vector<8x8xf32> -> vector<8x8xf32>
    %61 = vector.extract_strided_slice %17 {offsets = [0, 16], sizes = [8, 8], strides = [1, 1]} : vector<8x32xf32> to vector<8x8xf32>
    %62 = vector.extract_strided_slice %25 {offsets = [0, 16], sizes = [8, 8], strides = [1, 1]} : vector<8x32xf32> to vector<8x8xf32>
    %cst_33 = arith.constant dense<0.000000e+00> : vector<8x8xf32>
    %63 = tpu.matmul %61, %62, %cst_33 {dimension_numbers = #tpu.dot_dimension_numbers<[1], [1], [0], [0], [0, 0, 1, 0], [], []>} : vector<8x8xf32>, vector<8x8xf32>, vector<8x8xf32> -> vector<8x8xf32>
    %cst_34 = arith.constant 0.353553385 : f32
    %64 = vector.broadcast %cst_34 : f32 to vector<8x8xf32>
    %65 = arith.mulf %63, %64 : vector<8x8xf32>
    %cst_35 = arith.constant dense<0xFF800000> : vector<8xf32>
    %66 = vector.multi_reduction <maximumf>, %65, %cst_35 [1] : vector<8x8xf32> to vector<8xf32>
    %67 = vector.shape_cast %66 : vector<8xf32> to vector<8x1xf32>
    %68 = vector.broadcast %67 : vector<8x1xf32> to vector<8x8xf32>
    %69 = arith.subf %65, %68 : vector<8x8xf32>
    %70 = math.exp %69 : vector<8x8xf32>
    %cst_36 = arith.constant dense<0.000000e+00> : vector<8xf32>
    %71 = vector.multi_reduction <add>, %70, %cst_36 [1] : vector<8x8xf32> to vector<8xf32>
    %72 = vector.shape_cast %71 : vector<8xf32> to vector<8x1xf32>
    %73 = tpu.reciprocal %72 {approx = true} : vector<8x1xf32> -> vector<8x1xf32>
    %74 = vector.broadcast %73 : vector<8x1xf32> to vector<8x8xf32>
    %75 = arith.mulf %70, %74 : vector<8x8xf32>
    %76 = vector.extract_strided_slice %26 {offsets = [0, 16], sizes = [8, 8], strides = [1, 1]} : vector<8x32xf32> to vector<8x8xf32>
    %cst_37 = arith.constant dense<0.000000e+00> : vector<8x8xf32>
    %77 = tpu.matmul %75, %76, %cst_37 {dimension_numbers = #tpu.dot_dimension_numbers<[1], [0], [0], [1], [0, 0, 1, 1], [], []>} : vector<8x8xf32>, vector<8x8xf32>, vector<8x8xf32> -> vector<8x8xf32>
    %78 = vector.extract_strided_slice %17 {offsets = [0, 24], sizes = [8, 8], strides = [1, 1]} : vector<8x32xf32> to vector<8x8xf32>
    %79 = vector.extract_strided_slice %25 {offsets = [0, 24], sizes = [8, 8], strides = [1, 1]} : vector<8x32xf32> to vector<8x8xf32>
    %cst_38 = arith.constant dense<0.000000e+00> : vector<8x8xf32>
    %80 = tpu.matmul %78, %79, %cst_38 {dimension_numbers = #tpu.dot_dimension_numbers<[1], [1], [0], [0], [0, 0, 1, 0], [], []>} : vector<8x8xf32>, vector<8x8xf32>, vector<8x8xf32> -> vector<8x8xf32>
    %cst_39 = arith.constant 0.353553385 : f32
    %81 = vector.broadcast %cst_39 : f32 to vector<8x8xf32>
    %82 = arith.mulf %80, %81 : vector<8x8xf32>
    %cst_40 = arith.constant dense<0xFF800000> : vector<8xf32>
    %83 = vector.multi_reduction <maximumf>, %82, %cst_40 [1] : vector<8x8xf32> to vector<8xf32>
    %84 = vector.shape_cast %83 : vector<8xf32> to vector<8x1xf32>
    %85 = vector.broadcast %84 : vector<8x1xf32> to vector<8x8xf32>
    %86 = arith.subf %82, %85 : vector<8x8xf32>
    %87 = math.exp %86 : vector<8x8xf32>
    %cst_41 = arith.constant dense<0.000000e+00> : vector<8xf32>
    %88 = vector.multi_reduction <add>, %87, %cst_41 [1] : vector<8x8xf32> to vector<8xf32>
    %89 = vector.shape_cast %88 : vector<8xf32> to vector<8x1xf32>
    %90 = tpu.reciprocal %89 {approx = true} : vector<8x1xf32> -> vector<8x1xf32>
    %91 = vector.broadcast %90 : vector<8x1xf32> to vector<8x8xf32>
    %92 = arith.mulf %87, %91 : vector<8x8xf32>
    %93 = vector.extract_strided_slice %26 {offsets = [0, 24], sizes = [8, 8], strides = [1, 1]} : vector<8x32xf32> to vector<8x8xf32>
    %cst_42 = arith.constant dense<0.000000e+00> : vector<8x8xf32>
    %94 = tpu.matmul %92, %93, %cst_42 {dimension_numbers = #tpu.dot_dimension_numbers<[1], [0], [0], [1], [0, 0, 1, 1], [], []>} : vector<8x8xf32>, vector<8x8xf32>, vector<8x8xf32> -> vector<8x8xf32>
    %95 = tpu.concatenate %43, %60, %77, %94 in 1 : vector<8x8xf32>, vector<8x8xf32>, vector<8x8xf32>, vector<8x8xf32> -> vector<8x32xf32>
    %c0_43 = arith.constant 0 : index
    %c0_44 = arith.constant 0 : index
    %c0_45 = arith.constant 0 : index
    %96 = vector.load %arg10[%c0_43, %c0_44, %c0_45] : memref<2x32x32xf32, #tpu.memory_space<vmem>>, vector<1x32x32xf32>
    %97 = vector.shape_cast %96 : vector<1x32x32xf32> to vector<32x32xf32>
    %cst_46 = arith.constant dense<0.000000e+00> : vector<8x32xf32>
    %98 = tpu.matmul %95, %97, %cst_46 {dimension_numbers = #tpu.dot_dimension_numbers<[1], [0], [0], [1], [0, 0, 1, 1], [], []>} : vector<8x32xf32>, vector<32x32xf32>, vector<8x32xf32> -> vector<8x32xf32>
    %c0_47 = arith.constant 0 : index
    %c0_48 = arith.constant 0 : index
    %c0_49 = arith.constant 0 : index
    %99 = vector.load %arg11[%c0_47, %c0_48, %c0_49] : memref<2x1x32xf32, #tpu.memory_space<vmem>>, vector<1x1x32xf32>
    %100 = vector.shape_cast %99 : vector<1x1x32xf32> to vector<1x32xf32>
    %101 = vector.broadcast %100 : vector<1x32xf32> to vector<8x32xf32>
    %102 = arith.addf %98, %101 : vector<8x32xf32>
    %103 = arith.addf %10, %102 : vector<8x32xf32>
    %c0_50 = arith.constant 0 : index
    %c0_51 = arith.constant 0 : index
    %c0_52 = arith.constant 0 : index
    %104 = vector.load %arg12[%c0_50, %c0_51, %c0_52] : memref<2x1x32xf32, #tpu.memory_space<vmem>>, vector<1x1x32xf32>
    %105 = vector.shape_cast %104 : vector<1x1x32xf32> to vector<1x32xf32>
    %c0_53 = arith.constant 0 : index
    %c0_54 = arith.constant 0 : index
    %c0_55 = arith.constant 0 : index
    %106 = vector.load %arg13[%c0_53, %c0_54, %c0_55] : memref<2x1x32xf32, #tpu.memory_space<vmem>>, vector<1x1x32xf32>
    %107 = vector.shape_cast %106 : vector<1x1x32xf32> to vector<1x32xf32>
    %cst_56 = arith.constant dense<0.000000e+00> : vector<8xf32>
    %108 = vector.multi_reduction <add>, %103, %cst_56 [1] : vector<8x32xf32> to vector<8xf32>
    %109 = vector.shape_cast %108 : vector<8xf32> to vector<8x1xf32>
    %cst_57 = arith.constant 3.200000e+01 : f32
    %110 = vector.broadcast %cst_57 : f32 to vector<8x1xf32>
    %111 = arith.divf %109, %110 : vector<8x1xf32>
    %112 = vector.broadcast %111 : vector<8x1xf32> to vector<8x32xf32>
    %113 = arith.subf %103, %112 : vector<8x32xf32>
    %114 = arith.mulf %113, %113 : vector<8x32xf32>
    %cst_58 = arith.constant dense<0.000000e+00> : vector<8xf32>
    %115 = vector.multi_reduction <add>, %114, %cst_58 [1] : vector<8x32xf32> to vector<8xf32>
    %116 = vector.shape_cast %115 : vector<8xf32> to vector<8x1xf32>
    %cst_59 = arith.constant 3.200000e+01 : f32
    %117 = vector.broadcast %cst_59 : f32 to vector<8x1xf32>
    %118 = arith.divf %116, %117 : vector<8x1xf32>
    %119 = vector.broadcast %111 : vector<8x1xf32> to vector<8x32xf32>
    %120 = arith.subf %103, %119 : vector<8x32xf32>
    %cst_60 = arith.constant 9.99999974E-6 : f32
    %121 = vector.broadcast %cst_60 : f32 to vector<8x1xf32>
    %122 = arith.addf %118, %121 : vector<8x1xf32>
    %123 = math.rsqrt %122 : vector<8x1xf32>
    %124 = vector.broadcast %123 : vector<8x1xf32> to vector<8x32xf32>
    %125 = arith.mulf %120, %124 : vector<8x32xf32>
    %126 = vector.broadcast %105 : vector<1x32xf32> to vector<8x32xf32>
    %127 = arith.mulf %125, %126 : vector<8x32xf32>
    %128 = vector.broadcast %107 : vector<1x32xf32> to vector<8x32xf32>
    %129 = arith.addf %127, %128 : vector<8x32xf32>
    %c0_61 = arith.constant 0 : index
    %c0_62 = arith.constant 0 : index
    %c0_63 = arith.constant 0 : index
    %130 = vector.load %arg14[%c0_61, %c0_62, %c0_63] : memref<2x32x128xf32, #tpu.memory_space<vmem>>, vector<1x32x128xf32>
    %131 = vector.shape_cast %130 : vector<1x32x128xf32> to vector<32x128xf32>
    %cst_64 = arith.constant dense<0.000000e+00> : vector<8x128xf32>
    %132 = tpu.matmul %129, %131, %cst_64 {dimension_numbers = #tpu.dot_dimension_numbers<[1], [0], [0], [1], [0, 0, 1, 1], [], []>} : vector<8x32xf32>, vector<32x128xf32>, vector<8x128xf32> -> vector<8x128xf32>
    %c0_65 = arith.constant 0 : index
    %c0_66 = arith.constant 0 : index
    %c0_67 = arith.constant 0 : index
    %133 = vector.load %arg15[%c0_65, %c0_66, %c0_67] : memref<2x1x128xf32, #tpu.memory_space<vmem>>, vector<1x1x128xf32>
    %134 = vector.shape_cast %133 : vector<1x1x128xf32> to vector<1x128xf32>
    %135 = vector.broadcast %134 : vector<1x128xf32> to vector<8x128xf32>
    %136 = arith.addf %132, %135 : vector<8x128xf32>
    %cst_68 = arith.constant 0.000000e+00 : f32
    %137 = vector.broadcast %cst_68 : f32 to vector<8x128xf32>
    %138 = arith.maximumf %136, %137 : vector<8x128xf32>
    %c0_69 = arith.constant 0 : index
    %c0_70 = arith.constant 0 : index
    %c0_71 = arith.constant 0 : index
    %139 = vector.load %arg16[%c0_69, %c0_70, %c0_71] : memref<2x128x32xf32, #tpu.memory_space<vmem>>, vector<1x128x32xf32>
    %140 = vector.shape_cast %139 : vector<1x128x32xf32> to vector<128x32xf32>
    %cst_72 = arith.constant dense<0.000000e+00> : vector<8x32xf32>
    %141 = tpu.matmul %138, %140, %cst_72 {dimension_numbers = #tpu.dot_dimension_numbers<[1], [0], [0], [1], [0, 0, 1, 1], [], []>} : vector<8x128xf32>, vector<128x32xf32>, vector<8x32xf32> -> vector<8x32xf32>
    %c0_73 = arith.constant 0 : index
    %c0_74 = arith.constant 0 : index
    %c0_75 = arith.constant 0 : index
    %142 = vector.load %arg17[%c0_73, %c0_74, %c0_75] : memref<2x1x32xf32, #tpu.memory_space<vmem>>, vector<1x1x32xf32>
    %143 = vector.shape_cast %142 : vector<1x1x32xf32> to vector<1x32xf32>
    %144 = vector.broadcast %143 : vector<1x32xf32> to vector<8x32xf32>
    %145 = arith.addf %141, %144 : vector<8x32xf32>
    %146 = arith.addf %129, %145 : vector<8x32xf32>
    %c0_76 = arith.constant 0 : index
    %c0_77 = arith.constant 0 : index
    %c0_78 = arith.constant 0 : index
    %147 = vector.load %arg18[%c0_76, %c0_77, %c0_78] : memref<2x1x32xf32, #tpu.memory_space<vmem>>, vector<1x1x32xf32>
    %148 = vector.shape_cast %147 : vector<1x1x32xf32> to vector<1x32xf32>
    %c0_79 = arith.constant 0 : index
    %c0_80 = arith.constant 0 : index
    %c0_81 = arith.constant 0 : index
    %149 = vector.load %arg19[%c0_79, %c0_80, %c0_81] : memref<2x1x32xf32, #tpu.memory_space<vmem>>, vector<1x1x32xf32>
    %150 = vector.shape_cast %149 : vector<1x1x32xf32> to vector<1x32xf32>
    %cst_82 = arith.constant dense<0.000000e+00> : vector<8xf32>
    %151 = vector.multi_reduction <add>, %146, %cst_82 [1] : vector<8x32xf32> to vector<8xf32>
    %152 = vector.shape_cast %151 : vector<8xf32> to vector<8x1xf32>
    %cst_83 = arith.constant 3.200000e+01 : f32
    %153 = vector.broadcast %cst_83 : f32 to vector<8x1xf32>
    %154 = arith.divf %152, %153 : vector<8x1xf32>
    %155 = vector.broadcast %154 : vector<8x1xf32> to vector<8x32xf32>
    %156 = arith.subf %146, %155 : vector<8x32xf32>
    %157 = arith.mulf %156, %156 : vector<8x32xf32>
    %cst_84 = arith.constant dense<0.000000e+00> : vector<8xf32>
    %158 = vector.multi_reduction <add>, %157, %cst_84 [1] : vector<8x32xf32> to vector<8xf32>
    %159 = vector.shape_cast %158 : vector<8xf32> to vector<8x1xf32>
    %cst_85 = arith.constant 3.200000e+01 : f32
    %160 = vector.broadcast %cst_85 : f32 to vector<8x1xf32>
    %161 = arith.divf %159, %160 : vector<8x1xf32>
    %162 = vector.broadcast %154 : vector<8x1xf32> to vector<8x32xf32>
    %163 = arith.subf %146, %162 : vector<8x32xf32>
    %cst_86 = arith.constant 9.99999974E-6 : f32
    %164 = vector.broadcast %cst_86 : f32 to vector<8x1xf32>
    %165 = arith.addf %161, %164 : vector<8x1xf32>
    %166 = math.rsqrt %165 : vector<8x1xf32>
    %167 = vector.broadcast %166 : vector<8x1xf32> to vector<8x32xf32>
    %168 = arith.mulf %163, %167 : vector<8x32xf32>
    %169 = vector.broadcast %148 : vector<1x32xf32> to vector<8x32xf32>
    %170 = arith.mulf %168, %169 : vector<8x32xf32>
    %171 = vector.broadcast %150 : vector<1x32xf32> to vector<8x32xf32>
    %172 = arith.addf %170, %171 : vector<8x32xf32>
    %c1 = arith.constant 1 : index
    %c0_87 = arith.constant 0 : index
    %c0_88 = arith.constant 0 : index
    %173 = vector.load %arg6[%c1, %c0_87, %c0_88] : memref<2x32x32xf32, #tpu.memory_space<vmem>>, vector<1x32x32xf32>
    %174 = vector.shape_cast %173 : vector<1x32x32xf32> to vector<32x32xf32>
    %cst_89 = arith.constant dense<0.000000e+00> : vector<8x32xf32>
    %175 = tpu.matmul %172, %174, %cst_89 {dimension_numbers = #tpu.dot_dimension_numbers<[1], [0], [0], [1], [0, 0, 1, 1], [], []>} : vector<8x32xf32>, vector<32x32xf32>, vector<8x32xf32> -> vector<8x32xf32>
    %c1_90 = arith.constant 1 : index
    %c0_91 = arith.constant 0 : index
    %c0_92 = arith.constant 0 : index
    %176 = vector.load %arg7[%c1_90, %c0_91, %c0_92] : memref<2x1x32xf32, #tpu.memory_space<vmem>>, vector<1x1x32xf32>
    %177 = vector.shape_cast %176 : vector<1x1x32xf32> to vector<1x32xf32>
    %178 = vector.broadcast %177 : vector<1x32xf32> to vector<8x32xf32>
    %179 = arith.addf %175, %178 : vector<8x32xf32>
    %c1_93 = arith.constant 1 : index
    %c0_94 = arith.constant 0 : index
    %c0_95 = arith.constant 0 : index
    %180 = vector.load %arg8[%c1_93, %c0_94, %c0_95] : memref<2x32x64xf32, #tpu.memory_space<vmem>>, vector<1x32x64xf32>
    %181 = vector.shape_cast %180 : vector<1x32x64xf32> to vector<32x64xf32>
    %cst_96 = arith.constant dense<0.000000e+00> : vector<8x64xf32>
    %182 = tpu.matmul %9, %181, %cst_96 {dimension_numbers = #tpu.dot_dimension_numbers<[1], [0], [0], [1], [0, 0, 1, 1], [], []>} : vector<8x32xf32>, vector<32x64xf32>, vector<8x64xf32> -> vector<8x64xf32>
    %c1_97 = arith.constant 1 : index
    %c0_98 = arith.constant 0 : index
    %c0_99 = arith.constant 0 : index
    %183 = vector.load %arg9[%c1_97, %c0_98, %c0_99] : memref<2x1x64xf32, #tpu.memory_space<vmem>>, vector<1x1x64xf32>
    %184 = vector.shape_cast %183 : vector<1x1x64xf32> to vector<1x64xf32>
    %185 = vector.broadcast %184 : vector<1x64xf32> to vector<8x64xf32>
    %186 = arith.addf %182, %185 : vector<8x64xf32>
    %187 = vector.extract_strided_slice %186 {offsets = [0, 0], sizes = [8, 32], strides = [1, 1]} : vector<8x64xf32> to vector<8x32xf32>
    %188 = vector.extract_strided_slice %186 {offsets = [0, 32], sizes = [8, 32], strides = [1, 1]} : vector<8x64xf32> to vector<8x32xf32>
    %189 = vector.extract_strided_slice %179 {offsets = [0, 0], sizes = [8, 8], strides = [1, 1]} : vector<8x32xf32> to vector<8x8xf32>
    %190 = vector.extract_strided_slice %187 {offsets = [0, 0], sizes = [8, 8], strides = [1, 1]} : vector<8x32xf32> to vector<8x8xf32>
    %cst_100 = arith.constant dense<0.000000e+00> : vector<8x8xf32>
    %191 = tpu.matmul %189, %190, %cst_100 {dimension_numbers = #tpu.dot_dimension_numbers<[1], [1], [0], [0], [0, 0, 1, 0], [], []>} : vector<8x8xf32>, vector<8x8xf32>, vector<8x8xf32> -> vector<8x8xf32>
    %cst_101 = arith.constant 0.353553385 : f32
    %192 = vector.broadcast %cst_101 : f32 to vector<8x8xf32>
    %193 = arith.mulf %191, %192 : vector<8x8xf32>
    %cst_102 = arith.constant dense<0xFF800000> : vector<8xf32>
    %194 = vector.multi_reduction <maximumf>, %193, %cst_102 [1] : vector<8x8xf32> to vector<8xf32>
    %195 = vector.shape_cast %194 : vector<8xf32> to vector<8x1xf32>
    %196 = vector.broadcast %195 : vector<8x1xf32> to vector<8x8xf32>
    %197 = arith.subf %193, %196 : vector<8x8xf32>
    %198 = math.exp %197 : vector<8x8xf32>
    %cst_103 = arith.constant dense<0.000000e+00> : vector<8xf32>
    %199 = vector.multi_reduction <add>, %198, %cst_103 [1] : vector<8x8xf32> to vector<8xf32>
    %200 = vector.shape_cast %199 : vector<8xf32> to vector<8x1xf32>
    %201 = tpu.reciprocal %200 {approx = true} : vector<8x1xf32> -> vector<8x1xf32>
    %202 = vector.broadcast %201 : vector<8x1xf32> to vector<8x8xf32>
    %203 = arith.mulf %198, %202 : vector<8x8xf32>
    %204 = vector.extract_strided_slice %188 {offsets = [0, 0], sizes = [8, 8], strides = [1, 1]} : vector<8x32xf32> to vector<8x8xf32>
    %cst_104 = arith.constant dense<0.000000e+00> : vector<8x8xf32>
    %205 = tpu.matmul %203, %204, %cst_104 {dimension_numbers = #tpu.dot_dimension_numbers<[1], [0], [0], [1], [0, 0, 1, 1], [], []>} : vector<8x8xf32>, vector<8x8xf32>, vector<8x8xf32> -> vector<8x8xf32>
    %206 = vector.extract_strided_slice %179 {offsets = [0, 8], sizes = [8, 8], strides = [1, 1]} : vector<8x32xf32> to vector<8x8xf32>
    %207 = vector.extract_strided_slice %187 {offsets = [0, 8], sizes = [8, 8], strides = [1, 1]} : vector<8x32xf32> to vector<8x8xf32>
    %cst_105 = arith.constant dense<0.000000e+00> : vector<8x8xf32>
    %208 = tpu.matmul %206, %207, %cst_105 {dimension_numbers = #tpu.dot_dimension_numbers<[1], [1], [0], [0], [0, 0, 1, 0], [], []>} : vector<8x8xf32>, vector<8x8xf32>, vector<8x8xf32> -> vector<8x8xf32>
    %cst_106 = arith.constant 0.353553385 : f32
    %209 = vector.broadcast %cst_106 : f32 to vector<8x8xf32>
    %210 = arith.mulf %208, %209 : vector<8x8xf32>
    %cst_107 = arith.constant dense<0xFF800000> : vector<8xf32>
    %211 = vector.multi_reduction <maximumf>, %210, %cst_107 [1] : vector<8x8xf32> to vector<8xf32>
    %212 = vector.shape_cast %211 : vector<8xf32> to vector<8x1xf32>
    %213 = vector.broadcast %212 : vector<8x1xf32> to vector<8x8xf32>
    %214 = arith.subf %210, %213 : vector<8x8xf32>
    %215 = math.exp %214 : vector<8x8xf32>
    %cst_108 = arith.constant dense<0.000000e+00> : vector<8xf32>
    %216 = vector.multi_reduction <add>, %215, %cst_108 [1] : vector<8x8xf32> to vector<8xf32>
    %217 = vector.shape_cast %216 : vector<8xf32> to vector<8x1xf32>
    %218 = tpu.reciprocal %217 {approx = true} : vector<8x1xf32> -> vector<8x1xf32>
    %219 = vector.broadcast %218 : vector<8x1xf32> to vector<8x8xf32>
    %220 = arith.mulf %215, %219 : vector<8x8xf32>
    %221 = vector.extract_strided_slice %188 {offsets = [0, 8], sizes = [8, 8], strides = [1, 1]} : vector<8x32xf32> to vector<8x8xf32>
    %cst_109 = arith.constant dense<0.000000e+00> : vector<8x8xf32>
    %222 = tpu.matmul %220, %221, %cst_109 {dimension_numbers = #tpu.dot_dimension_numbers<[1], [0], [0], [1], [0, 0, 1, 1], [], []>} : vector<8x8xf32>, vector<8x8xf32>, vector<8x8xf32> -> vector<8x8xf32>
    %223 = vector.extract_strided_slice %179 {offsets = [0, 16], sizes = [8, 8], strides = [1, 1]} : vector<8x32xf32> to vector<8x8xf32>
    %224 = vector.extract_strided_slice %187 {offsets = [0, 16], sizes = [8, 8], strides = [1, 1]} : vector<8x32xf32> to vector<8x8xf32>
    %cst_110 = arith.constant dense<0.000000e+00> : vector<8x8xf32>
    %225 = tpu.matmul %223, %224, %cst_110 {dimension_numbers = #tpu.dot_dimension_numbers<[1], [1], [0], [0], [0, 0, 1, 0], [], []>} : vector<8x8xf32>, vector<8x8xf32>, vector<8x8xf32> -> vector<8x8xf32>
    %cst_111 = arith.constant 0.353553385 : f32
    %226 = vector.broadcast %cst_111 : f32 to vector<8x8xf32>
    %227 = arith.mulf %225, %226 : vector<8x8xf32>
    %cst_112 = arith.constant dense<0xFF800000> : vector<8xf32>
    %228 = vector.multi_reduction <maximumf>, %227, %cst_112 [1] : vector<8x8xf32> to vector<8xf32>
    %229 = vector.shape_cast %228 : vector<8xf32> to vector<8x1xf32>
    %230 = vector.broadcast %229 : vector<8x1xf32> to vector<8x8xf32>
    %231 = arith.subf %227, %230 : vector<8x8xf32>
    %232 = math.exp %231 : vector<8x8xf32>
    %cst_113 = arith.constant dense<0.000000e+00> : vector<8xf32>
    %233 = vector.multi_reduction <add>, %232, %cst_113 [1] : vector<8x8xf32> to vector<8xf32>
    %234 = vector.shape_cast %233 : vector<8xf32> to vector<8x1xf32>
    %235 = tpu.reciprocal %234 {approx = true} : vector<8x1xf32> -> vector<8x1xf32>
    %236 = vector.broadcast %235 : vector<8x1xf32> to vector<8x8xf32>
    %237 = arith.mulf %232, %236 : vector<8x8xf32>
    %238 = vector.extract_strided_slice %188 {offsets = [0, 16], sizes = [8, 8], strides = [1, 1]} : vector<8x32xf32> to vector<8x8xf32>
    %cst_114 = arith.constant dense<0.000000e+00> : vector<8x8xf32>
    %239 = tpu.matmul %237, %238, %cst_114 {dimension_numbers = #tpu.dot_dimension_numbers<[1], [0], [0], [1], [0, 0, 1, 1], [], []>} : vector<8x8xf32>, vector<8x8xf32>, vector<8x8xf32> -> vector<8x8xf32>
    %240 = vector.extract_strided_slice %179 {offsets = [0, 24], sizes = [8, 8], strides = [1, 1]} : vector<8x32xf32> to vector<8x8xf32>
    %241 = vector.extract_strided_slice %187 {offsets = [0, 24], sizes = [8, 8], strides = [1, 1]} : vector<8x32xf32> to vector<8x8xf32>
    %cst_115 = arith.constant dense<0.000000e+00> : vector<8x8xf32>
    %242 = tpu.matmul %240, %241, %cst_115 {dimension_numbers = #tpu.dot_dimension_numbers<[1], [1], [0], [0], [0, 0, 1, 0], [], []>} : vector<8x8xf32>, vector<8x8xf32>, vector<8x8xf32> -> vector<8x8xf32>
    %cst_116 = arith.constant 0.353553385 : f32
    %243 = vector.broadcast %cst_116 : f32 to vector<8x8xf32>
    %244 = arith.mulf %242, %243 : vector<8x8xf32>
    %cst_117 = arith.constant dense<0xFF800000> : vector<8xf32>
    %245 = vector.multi_reduction <maximumf>, %244, %cst_117 [1] : vector<8x8xf32> to vector<8xf32>
    %246 = vector.shape_cast %245 : vector<8xf32> to vector<8x1xf32>
    %247 = vector.broadcast %246 : vector<8x1xf32> to vector<8x8xf32>
    %248 = arith.subf %244, %247 : vector<8x8xf32>
    %249 = math.exp %248 : vector<8x8xf32>
    %cst_118 = arith.constant dense<0.000000e+00> : vector<8xf32>
    %250 = vector.multi_reduction <add>, %249, %cst_118 [1] : vector<8x8xf32> to vector<8xf32>
    %251 = vector.shape_cast %250 : vector<8xf32> to vector<8x1xf32>
    %252 = tpu.reciprocal %251 {approx = true} : vector<8x1xf32> -> vector<8x1xf32>
    %253 = vector.broadcast %252 : vector<8x1xf32> to vector<8x8xf32>
    %254 = arith.mulf %249, %253 : vector<8x8xf32>
    %255 = vector.extract_strided_slice %188 {offsets = [0, 24], sizes = [8, 8], strides = [1, 1]} : vector<8x32xf32> to vector<8x8xf32>
    %cst_119 = arith.constant dense<0.000000e+00> : vector<8x8xf32>
    %256 = tpu.matmul %254, %255, %cst_119 {dimension_numbers = #tpu.dot_dimension_numbers<[1], [0], [0], [1], [0, 0, 1, 1], [], []>} : vector<8x8xf32>, vector<8x8xf32>, vector<8x8xf32> -> vector<8x8xf32>
    %257 = tpu.concatenate %205, %222, %239, %256 in 1 : vector<8x8xf32>, vector<8x8xf32>, vector<8x8xf32>, vector<8x8xf32> -> vector<8x32xf32>
    %c1_120 = arith.constant 1 : index
    %c0_121 = arith.constant 0 : index
    %c0_122 = arith.constant 0 : index
    %258 = vector.load %arg10[%c1_120, %c0_121, %c0_122] : memref<2x32x32xf32, #tpu.memory_space<vmem>>, vector<1x32x32xf32>
    %259 = vector.shape_cast %258 : vector<1x32x32xf32> to vector<32x32xf32>
    %cst_123 = arith.constant dense<0.000000e+00> : vector<8x32xf32>
    %260 = tpu.matmul %257, %259, %cst_123 {dimension_numbers = #tpu.dot_dimension_numbers<[1], [0], [0], [1], [0, 0, 1, 1], [], []>} : vector<8x32xf32>, vector<32x32xf32>, vector<8x32xf32> -> vector<8x32xf32>
    %c1_124 = arith.constant 1 : index
    %c0_125 = arith.constant 0 : index
    %c0_126 = arith.constant 0 : index
    %261 = vector.load %arg11[%c1_124, %c0_125, %c0_126] : memref<2x1x32xf32, #tpu.memory_space<vmem>>, vector<1x1x32xf32>
    %262 = vector.shape_cast %261 : vector<1x1x32xf32> to vector<1x32xf32>
    %263 = vector.broadcast %262 : vector<1x32xf32> to vector<8x32xf32>
    %264 = arith.addf %260, %263 : vector<8x32xf32>
    %265 = arith.addf %172, %264 : vector<8x32xf32>
    %c1_127 = arith.constant 1 : index
    %c0_128 = arith.constant 0 : index
    %c0_129 = arith.constant 0 : index
    %266 = vector.load %arg12[%c1_127, %c0_128, %c0_129] : memref<2x1x32xf32, #tpu.memory_space<vmem>>, vector<1x1x32xf32>
    %267 = vector.shape_cast %266 : vector<1x1x32xf32> to vector<1x32xf32>
    %c1_130 = arith.constant 1 : index
    %c0_131 = arith.constant 0 : index
    %c0_132 = arith.constant 0 : index
    %268 = vector.load %arg13[%c1_130, %c0_131, %c0_132] : memref<2x1x32xf32, #tpu.memory_space<vmem>>, vector<1x1x32xf32>
    %269 = vector.shape_cast %268 : vector<1x1x32xf32> to vector<1x32xf32>
    %cst_133 = arith.constant dense<0.000000e+00> : vector<8xf32>
    %270 = vector.multi_reduction <add>, %265, %cst_133 [1] : vector<8x32xf32> to vector<8xf32>
    %271 = vector.shape_cast %270 : vector<8xf32> to vector<8x1xf32>
    %cst_134 = arith.constant 3.200000e+01 : f32
    %272 = vector.broadcast %cst_134 : f32 to vector<8x1xf32>
    %273 = arith.divf %271, %272 : vector<8x1xf32>
    %274 = vector.broadcast %273 : vector<8x1xf32> to vector<8x32xf32>
    %275 = arith.subf %265, %274 : vector<8x32xf32>
    %276 = arith.mulf %275, %275 : vector<8x32xf32>
    %cst_135 = arith.constant dense<0.000000e+00> : vector<8xf32>
    %277 = vector.multi_reduction <add>, %276, %cst_135 [1] : vector<8x32xf32> to vector<8xf32>
    %278 = vector.shape_cast %277 : vector<8xf32> to vector<8x1xf32>
    %cst_136 = arith.constant 3.200000e+01 : f32
    %279 = vector.broadcast %cst_136 : f32 to vector<8x1xf32>
    %280 = arith.divf %278, %279 : vector<8x1xf32>
    %281 = vector.broadcast %273 : vector<8x1xf32> to vector<8x32xf32>
    %282 = arith.subf %265, %281 : vector<8x32xf32>
    %cst_137 = arith.constant 9.99999974E-6 : f32
    %283 = vector.broadcast %cst_137 : f32 to vector<8x1xf32>
    %284 = arith.addf %280, %283 : vector<8x1xf32>
    %285 = math.rsqrt %284 : vector<8x1xf32>
    %286 = vector.broadcast %285 : vector<8x1xf32> to vector<8x32xf32>
    %287 = arith.mulf %282, %286 : vector<8x32xf32>
    %288 = vector.broadcast %267 : vector<1x32xf32> to vector<8x32xf32>
    %289 = arith.mulf %287, %288 : vector<8x32xf32>
    %290 = vector.broadcast %269 : vector<1x32xf32> to vector<8x32xf32>
    %291 = arith.addf %289, %290 : vector<8x32xf32>
    %c1_138 = arith.constant 1 : index
    %c0_139 = arith.constant 0 : index
    %c0_140 = arith.constant 0 : index
    %292 = vector.load %arg14[%c1_138, %c0_139, %c0_140] : memref<2x32x128xf32, #tpu.memory_space<vmem>>, vector<1x32x128xf32>
    %293 = vector.shape_cast %292 : vector<1x32x128xf32> to vector<32x128xf32>
    %cst_141 = arith.constant dense<0.000000e+00> : vector<8x128xf32>
    %294 = tpu.matmul %291, %293, %cst_141 {dimension_numbers = #tpu.dot_dimension_numbers<[1], [0], [0], [1], [0, 0, 1, 1], [], []>} : vector<8x32xf32>, vector<32x128xf32>, vector<8x128xf32> -> vector<8x128xf32>
    %c1_142 = arith.constant 1 : index
    %c0_143 = arith.constant 0 : index
    %c0_144 = arith.constant 0 : index
    %295 = vector.load %arg15[%c1_142, %c0_143, %c0_144] : memref<2x1x128xf32, #tpu.memory_space<vmem>>, vector<1x1x128xf32>
    %296 = vector.shape_cast %295 : vector<1x1x128xf32> to vector<1x128xf32>
    %297 = vector.broadcast %296 : vector<1x128xf32> to vector<8x128xf32>
    %298 = arith.addf %294, %297 : vector<8x128xf32>
    %cst_145 = arith.constant 0.000000e+00 : f32
    %299 = vector.broadcast %cst_145 : f32 to vector<8x128xf32>
    %300 = arith.maximumf %298, %299 : vector<8x128xf32>
    %c1_146 = arith.constant 1 : index
    %c0_147 = arith.constant 0 : index
    %c0_148 = arith.constant 0 : index
    %301 = vector.load %arg16[%c1_146, %c0_147, %c0_148] : memref<2x128x32xf32, #tpu.memory_space<vmem>>, vector<1x128x32xf32>
    %302 = vector.shape_cast %301 : vector<1x128x32xf32> to vector<128x32xf32>
    %cst_149 = arith.constant dense<0.000000e+00> : vector<8x32xf32>
    %303 = tpu.matmul %300, %302, %cst_149 {dimension_numbers = #tpu.dot_dimension_numbers<[1], [0], [0], [1], [0, 0, 1, 1], [], []>} : vector<8x128xf32>, vector<128x32xf32>, vector<8x32xf32> -> vector<8x32xf32>
    %c1_150 = arith.constant 1 : index
    %c0_151 = arith.constant 0 : index
    %c0_152 = arith.constant 0 : index
    %304 = vector.load %arg17[%c1_150, %c0_151, %c0_152] : memref<2x1x32xf32, #tpu.memory_space<vmem>>, vector<1x1x32xf32>
    %305 = vector.shape_cast %304 : vector<1x1x32xf32> to vector<1x32xf32>
    %306 = vector.broadcast %305 : vector<1x32xf32> to vector<8x32xf32>
    %307 = arith.addf %303, %306 : vector<8x32xf32>
    %308 = arith.addf %291, %307 : vector<8x32xf32>
    %c1_153 = arith.constant 1 : index
    %c0_154 = arith.constant 0 : index
    %c0_155 = arith.constant 0 : index
    %309 = vector.load %arg18[%c1_153, %c0_154, %c0_155] : memref<2x1x32xf32, #tpu.memory_space<vmem>>, vector<1x1x32xf32>
    %310 = vector.shape_cast %309 : vector<1x1x32xf32> to vector<1x32xf32>
    %c1_156 = arith.constant 1 : index
    %c0_157 = arith.constant 0 : index
    %c0_158 = arith.constant 0 : index
    %311 = vector.load %arg19[%c1_156, %c0_157, %c0_158] : memref<2x1x32xf32, #tpu.memory_space<vmem>>, vector<1x1x32xf32>
    %312 = vector.shape_cast %311 : vector<1x1x32xf32> to vector<1x32xf32>
    %cst_159 = arith.constant dense<0.000000e+00> : vector<8xf32>
    %313 = vector.multi_reduction <add>, %308, %cst_159 [1] : vector<8x32xf32> to vector<8xf32>
    %314 = vector.shape_cast %313 : vector<8xf32> to vector<8x1xf32>
    %cst_160 = arith.constant 3.200000e+01 : f32
    %315 = vector.broadcast %cst_160 : f32 to vector<8x1xf32>
    %316 = arith.divf %314, %315 : vector<8x1xf32>
    %317 = vector.broadcast %316 : vector<8x1xf32> to vector<8x32xf32>
    %318 = arith.subf %308, %317 : vector<8x32xf32>
    %319 = arith.mulf %318, %318 : vector<8x32xf32>
    %cst_161 = arith.constant dense<0.000000e+00> : vector<8xf32>
    %320 = vector.multi_reduction <add>, %319, %cst_161 [1] : vector<8x32xf32> to vector<8xf32>
    %321 = vector.shape_cast %320 : vector<8xf32> to vector<8x1xf32>
    %cst_162 = arith.constant 3.200000e+01 : f32
    %322 = vector.broadcast %cst_162 : f32 to vector<8x1xf32>
    %323 = arith.divf %321, %322 : vector<8x1xf32>
    %324 = vector.broadcast %316 : vector<8x1xf32> to vector<8x32xf32>
    %325 = arith.subf %308, %324 : vector<8x32xf32>
    %cst_163 = arith.constant 9.99999974E-6 : f32
    %326 = vector.broadcast %cst_163 : f32 to vector<8x1xf32>
    %327 = arith.addf %323, %326 : vector<8x1xf32>
    %328 = math.rsqrt %327 : vector<8x1xf32>
    %329 = vector.broadcast %328 : vector<8x1xf32> to vector<8x32xf32>
    %330 = arith.mulf %325, %329 : vector<8x32xf32>
    %331 = vector.broadcast %310 : vector<1x32xf32> to vector<8x32xf32>
    %332 = arith.mulf %330, %331 : vector<8x32xf32>
    %333 = vector.broadcast %312 : vector<1x32xf32> to vector<8x32xf32>
    %334 = arith.addf %332, %333 : vector<8x32xf32>
    %cst_164 = arith.constant dense<0.000000e+00> : vector<8x8xf32>
    %335 = tpu.matmul %9, %334, %cst_164 {dimension_numbers = #tpu.dot_dimension_numbers<[1], [1], [0], [0], [0, 0, 1, 0], [], []>} : vector<8x32xf32>, vector<8x32xf32>, vector<8x8xf32> -> vector<8x8xf32>
    %336 = vector.broadcast %3 : f32 to vector<8x8xf32>
    %337 = arith.mulf %335, %336 : vector<8x8xf32>
    %c0_165 = arith.constant 0 : index
    %c0_166 = arith.constant 0 : index
    %338 = vector.load %arg22[%c0_165, %c0_166] : memref<8x32xf32, #tpu.memory_space<vmem>>, vector<8x32xf32>
    tpu.vector_store %arg22[%c0_165, %c0_166], %9 {strides = array<i32>} : memref<8x32xf32, #tpu.memory_space<vmem>>, vector<8x32xf32>,
    %c0_167 = arith.constant 0 : index
    %c0_168 = arith.constant 0 : index
    %339 = vector.load %arg23[%c0_167, %c0_168] : memref<8x32xf32, #tpu.memory_space<vmem>>, vector<8x32xf32>
    tpu.vector_store %arg23[%c0_167, %c0_168], %334 {strides = array<i32>} : memref<8x32xf32, #tpu.memory_space<vmem>>, vector<8x32xf32>,
    %c0_169 = arith.constant 0 : index
    %c0_170 = arith.constant 0 : index
    %340 = vector.load %arg20[%c0_169, %c0_170] : memref<8x8xf32, #tpu.memory_space<vmem>>, vector<8x8xf32>
    tpu.vector_store %arg20[%c0_169, %c0_170], %337 {strides = array<i32>} : memref<8x8xf32, #tpu.memory_space<vmem>>, vector<8x8xf32>,
    %cst_171 = arith.constant dense<0xFF800000> : vector<8xf32>
    %341 = vector.multi_reduction <maximumf>, %337, %cst_171 [1] : vector<8x8xf32> to vector<8xf32>
    %342 = vector.shape_cast %341 : vector<8xf32> to vector<8x1xf32>
    %343 = vector.broadcast %342 : vector<8x1xf32> to vector<8x8xf32>
    %344 = arith.subf %337, %343 : vector<8x8xf32>
    %345 = math.exp %344 : vector<8x8xf32>
    %cst_172 = arith.constant dense<0.000000e+00> : vector<8xf32>
    %346 = vector.multi_reduction <add>, %345, %cst_172 [1] : vector<8x8xf32> to vector<8xf32>
    %347 = vector.shape_cast %346 : vector<8xf32> to vector<8x1xf32>
    %348 = tpu.reciprocal %347 {approx = true} : vector<8x1xf32> -> vector<8x1xf32>
    %349 = vector.broadcast %348 : vector<8x1xf32> to vector<8x8xf32>
    %350 = arith.mulf %345, %349 : vector<8x8xf32>
    %c0_173 = arith.constant 0 : index
    %c0_174 = arith.constant 0 : index
    %351 = vector.load %arg21[%c0_173, %c0_174] : memref<8x8xf32, #tpu.memory_space<vmem>>, vector<8x8xf32>
    tpu.vector_store %arg21[%c0_173, %c0_174], %350 {strides = array<i32>} : memref<8x8xf32, #tpu.memory_space<vmem>>, vector<8x8xf32>,
    return
  }
}

</mosaic_0001>

<bundles_post_ra>
// kernel: tpu_custom_call.1
= control target key start
LH: loop header
LB: loop body
LE: loop exit
PB: predicated region body
PF: predicated region fallthrough
CT: control target
= control target key end

     0   :  { %s4088_s0 = inlined_call_operand.vmem [shape: f32[8], index: 0, kind: input, shape index: {}]   ;;  %s4089_s1 = inlined_call_operand.<no memory space> [shape: s32[1], index: 1, kind: input, shape index: {}]   ;;  %s4090_s2 = inlined_call_operand.vmem [shape: f32[8,3], index: 2, kind: input, shape index: {}]   ;;  %s4091_s3 = inlined_call_operand.vmem [shape: f32[3,32], index: 3, kind: input, shape index: {}]   ;;  %s4092_s4 = inlined_call_operand.vmem [shape: f32[1,32], index: 4, kind: input, shape index: {}]   ;;  %s4093_s5 = inlined_call_operand.vmem [shape: f32[8,32], index: 5, kind: input, shape index: {}]   ;;  %s4094_s6 = inlined_call_operand.vmem [shape: f32[2,32,32], index: 6, kind: input, shape index: {}]   ;;  %s4095_s7 = inlined_call_operand.vmem [shape: f32[2,1,32], index: 7, kind: input, shape index: {}]   ;;  %s4096_s8 = inlined_call_operand.vmem [shape: f32[2,32,64], index: 8, kind: input, shape index: {}]   ;;  %s4097_s9 = inlined_call_operand.vmem [shape: f32[2,1,64], index: 9, kind: input, shape index: {}]   ;;  %s4098_s10 = inlined_call_operand.vmem [shape: f32[2,32,32], index: 10, kind: input, shape index: {}]   ;;  %s4099_s11 = inlined_call_operand.vmem [shape: f32[2,1,32], index: 11, kind: input, shape index: {}]   ;;  %s4100_s12 = inlined_call_operand.vmem [shape: f32[2,1,32], index: 12, kind: input, shape index: {}]   ;;  %s4101_s13 = inlined_call_operand.vmem [shape: f32[2,1,32], index: 13, kind: input, shape index: {}]   ;;  %s4102_s14 = inlined_call_operand.vmem [shape: f32[2,32,128], index: 14, kind: input, shape index: {}]   ;;  %s4103_s15 = inlined_call_operand.vmem [shape: f32[2,1,128], index: 15, kind: input, shape index: {}]   ;;  %s4104_s16 = inlined_call_operand.vmem [shape: f32[2,128,32], index: 16, kind: input, shape index: {}]   ;;  %s4105_s17 = inlined_call_operand.vmem [shape: f32[2,1,32], index: 17, kind: input, shape index: {}]   ;;  %s4106_s18 = inlined_call_operand.vmem [shape: f32[2,1,32], index: 18, kind: input, shape index: {}]   ;;  %s4107_s19 = inlined_call_operand.vmem [shape: f32[2,1,32], index: 19, kind: input, shape index: {}]   ;;  %s4108_s20 = inlined_call_operand.hbm [shape: f32[8,8], index: 20, kind: output, shape index: {0}]   ;;  %s4109_s21 = inlined_call_operand.hbm [shape: f32[8,8], index: 21, kind: output, shape index: {1}]   ;;  %s4110_s22 = inlined_call_operand.hbm [shape: f32[8,32], index: 22, kind: output, shape index: {2}]   ;;  %s4111_s23 = inlined_call_operand.hbm [shape: f32[8,32], index: 23, kind: output, shape index: {3}]  }
   0x1   :  { %4120 = sst [smem:[#allocation16_spill]] %s4088_s0 }
   0x2   :  { %4121 = sst [smem:[#allocation17_spill]] %s4089_s1 }
   0x3   :  { %4122 = sst [smem:[#allocation18_spill]] %s4090_s2 }
   0x4   :  { %4123 = sst [smem:[#allocation19_spill]] %s4091_s3 }
   0x5   :  { %4124 = sst [smem:[#allocation20_spill]] %s4092_s4 }
   0x6   :  { %4125 = sst [smem:[#allocation21_spill]] %s4093_s5 }
   0x7   :  { %4126 = sst [smem:[#allocation22_spill]] %s4094_s6 }
   0x8   :  { %4127 = sst [smem:[#allocation23_spill]] %s4095_s7 }
   0x9   :  { %30 = vsyncpa [#allocation5], 0 }
   0xa   :  { %31 = vsyncpa [#allocation4], 0 }
   0xb   :  { %32 = vsyncpa [#allocation8], 0 }
   0xc   :  { %33 = vsyncpa [#allocation11], 0  ;;  %s4128_s24 = sld [smem:[#allocation16_spill]] }
  0x12   :  { %s40_s25 = sshll.u32 %s4128_s24, 4  ;;  %s41_s25 = int_to_ptr.vmem [resolvable:$true] %s40_s25 }
  0x13   :  { %s3291_s5 = scalar_lea.vmem %s41_s25, 16  ;;  %p3296_p1 = scmp.lt.s32.totalorder %s41_s25, %s41_s25 }
  0x14   :  { %p3292_p0 = scmp.ne.s32.totalorder %s41_s25, %s3291_s5  ;;  %p3297_p2 = scmp.lt.s32.totalorder %s3291_s5, %s3291_s5 }
  0x16   :  { %p3298_p3 = por %p3297_p2, %p3296_p1 }
  0x18   :  { %p3299_p4 = pnand %p3298_p3, %p3292_p0 }
  0x1a   :  { %3302 = shalt.err (!%p3299_p4)
}
  0x1b   :  { %s3399_s1 = smov [#allocation3]  }
  0x1c   :  { %43 = dma.vmem_to_smem %s41_s25, 16, %s3399_s1, [#allocation5]  }
  0x1d   :  { %3391 = dma.done.wait [#allocation5], 16  }
  0x1e   :  { %3392 = vsyncadd [#allocation5], 4294967280 }
  0x1f   :  { %85 = sfence }
  0x20   :  { %s4129_s6 = sld [smem:[#allocation19_spill]]  ;;  %vm104_vm0 = vcmask 1042432   ;;  %s4130_s28 = sld [smem:[#allocation18_spill]]  ;;  %v3400_v2 = vmov 0.0   ;;  %vm3401_vm1 = vmmov 0   ;;  %vm100_vm2 = vcmask 23552  }
  0x21   :  { %2881 = vmatprep.subr.mxu0 %v3400_v2  ;;  %2883 = vmatprep.mubr.msk.f32.mxu0 %vm3401_vm1, %v3400_v2  ;;  %s4131_s0 = sld [smem:[#allocation22_spill]]  ;;  %v3402_v8 = vmov 0.0|0.0   ;;  %v264_v10 = vld [vmem:[%s4096_s8] sm:$0xff]  ;;  %v265_v11 = vld [vmem:[%s4096_s8 + $0x8] sm:$0xff]  ;;  %s4132_s29 = sld [smem:[#allocation21_spill]]  ;;  %vm190_vm3 = vcmask 261120  }
  0x22   :  { %2918 = vmatprep.subr.mxu1 %v3400_v2  ;;  %2920 = vmatprep.mubr.msk.f32.mxu1 %vm3401_vm1, %v3400_v2  ;;  %v3136_v13 = vpack.c.bf16 %v265_v11, %v264_v10  ;;  %v266_v14 = vld [vmem:[%s4096_s8 + $0x10] sm:$0xff]  ;;  %v267_v15 = vld [vmem:[%s4096_s8 + $0x18] sm:$0xff]  ;;  %s4133_s1 = sld [smem:[#allocation20_spill]]  ;;  %v2680_v23 = vld [vmem:[%s4097_s9] ss:$0 sm:$0xff]  ;;  %vm348_vm4 = vcmask 64512  }
  0x23   :  { %v3139_v16 = vpack.c.bf16 %v267_v15, %v266_v14  ;;  %s4134_s7 = sld [smem:[#allocation23_spill]]  ;;  %s3405_s3 = smov 104   ;;  %vm1024_vm5 = vcmask 130048   ;;  %vm1026_vm6 = vcmask 195584  }
  0x24   :  { %s3406_s4 = smov 96   ;;  %s4114_s30 = smov 80  }
  0x25   :  { %s4115_s24 = smov 72   ;;  %s4119_s25 = smov 88  }
  0x26   :  { %v92_v0 = vld [vmem:[%s4129_s6] sm:$0x7]  ;;  %s4118_s5 = smov 8   ;;  %s4116_s26 = smov 24  }
  0x27   :  { %v91_v1 = vld [vmem:[%s4130_s28] sm:$0xff]  ;;  %v180_v4 = vld [vmem:[%s4131_s0 + $0x8] sm:$0xff]  ;;  %v181_v5 = vld [vmem:[%s4131_s0 + $0x10] sm:$0xff]  ;;  %2882 = vmatpush3.msk.msra.mxu0 %vm104_vm0, %v92_v0  ;;  %s3403_s28 = smov 112  }
  0x28   :  { %v179_v3 = vld [vmem:[%s4131_s0] sm:$0xff]  ;;  %v182_v7 = vld [vmem:[%s4131_s0 + $0x18] sm:$0xff]  ;;  %2884 = vmatmul.mubr.msk.f32.vlgmr.msra.gmra.mrb[0].mxu0 %vm100_vm2, %v91_v1  ;;  %3129 = vmatprep.subr.bf16.mxu0 %v3402_v8 }
  0x29   :  { %v3130_v6 = vpack.c.bf16 %v180_v4, %v179_v3  ;;  %v3133_v9 = vpack.c.bf16 %v182_v7, %v181_v5  ;;  %2894 = vmatprep.mubr.msk.f32.mxu0 %vm3401_vm1, %v3400_v2  ;;  %v3577_v12 = vld [vmem:[%s4132_s29] sm:$0xff]  ;;  %s3404_s29 = smov 120  }
  0x2a   :  { %v2675_v17 = vld [vmem:[%s4133_s1] ss:$0 sm:$0xff]  ;;  %s4117_s1 = smov 16  }
  0x2b   :  { %3131 = vmatpush3.bf16.msra.mxu0 %v3130_v6  ;;  %v2678_v27 = vld [vmem:[%s4134_s7] ss:$0 sm:$0xff] }
  0x2c   :  { %3132 = vmatprep.subr.bf16.mxu0 %v3402_v8 }
  0x2f   :  { %3134 = vmatpush3.bf16.msra.mxu0 %v3133_v9 }
  0x30   :  { %3135 = vmatprep.subr.bf16.mxu0 %v3402_v8 }
  0x32   :  { %2895 = vmatmul.mubr.msk.f32.vlgmr.msra.gmra.mrb[2].mxu0 %vm190_vm3, %v3577_v12 }
  0x33   :  { %3137 = vmatpush3.bf16.msra.mxu0 %v3136_v13  ;;  %2905 = vmatprep.mubr.msk.f32.mxu0 %vm3401_vm1, %v3400_v2 }
  0x34   :  { %3138 = vmatprep.subr.bf16.mxu0 %v3402_v8 }
  0x37   :  { %3140 = vmatpush3.bf16.msra.mxu0 %v3139_v16 }
  0x38   :  { %2908 = vmatprep.subr.mxu0 %v3400_v2 }
  0xfb   :  { %v174_v18 = vpop.f32.mrb[0].mxu0 }
  0xfc   :  { %v3595_v19 = vadd.f32 %v2675_v17, %v174_v18  ;;  %v2885_v20 = vpop.f32.mrb[1].mxu0 }
  0xfe   :  { %2604 = vst.msk [vmem:[#allocation9] sm:$0xff] %vm190_vm3, %v3595_v19  ;;  %2906 = vmatmul.mubr.msk.f32.vlgmr.msra.gmra.mrb[4].mxu0 %vm190_vm3, %v3595_v19 }
  0xff   :  { %2910 = vmatprep.mubr.msk.f32.mxu0 %vm3401_vm1, %v3400_v2 }
 0x105   :  { %v260_v21 = vpop.f32.mrb[2].mxu0 }
 0x106   :  { %v2896_v22 = vpop.f32.mrb[3].mxu0  ;;  %v261_v28 = vadd.f32 %v2678_v27, %v260_v21 }
 0x1d1   :  { %v344_v24 = vpop.f32.mrb[4].mxu0 }
 0x1d2   :  { %v3606_v25 = vadd.f32 %v2680_v23, %v344_v24  ;;  %v2907_v26 = vpop.f32.mrb[5].mxu0 }
 0x1d4   :  { %681 = vrot.lane.b32.xlu1 %v3606_v25, %s3403_s28  ;;  %515 = vrot.lane.b32.xlu0 %v3606_v25, %s3404_s29 }
 0x1d5   :  { %2909 = vmatpush3.xpose.msk.msra.mxu0 %vm348_vm4, %v3606_v25 }
 0x1d6   :  { %2913 = vmatprep.subr.mxu0 %v3400_v2 }
 0x1d8   :  { %2911 = vmatmul.mubr.msk.f32.vlgmr.msra.gmra.mrb[6].mxu0 %vm348_vm4, %v261_v28  ;;  %679 = vrot.lane.b32.xlu1 %v261_v28, %s3403_s28 }
 0x1d9   :  { %513 = vrot.lane.b32.xlu0 %v261_v28, %s3404_s29  ;;  %2915 = vmatprep.mubr.msk.f32.mxu0 %vm3401_vm1, %v3400_v2 }
 0x1dc   :  { %845 = vrot.lane.b32.xlu1 %v261_v28, %s3405_s3 }
 0x1dd   :  { %847 = vrot.lane.b32.xlu0 %v3606_v25, %s3405_s3 }
 0x246   :  { %v516_v29 = vpop.permute.xlu0 %515  ;;  %v682_v30 = vpop.permute.xlu1 %681 }
 0x247   :  { %2919 = vmatpush3.xpose.msk.msra.mxu1 %vm348_vm4, %v516_v29  ;;  %v1028_v29 = vld [vmem:[%s4098_s10] sm:$0xff] }
 0x248   :  { %2928 = vmatprep.subr.mxu1 %v3400_v2 }
 0x24a   :  { %v680_v32 = vpop.permute.xlu1 %679 }
 0x24b   :  { %v514_v31 = vpop.permute.xlu0 %513 }
 0x24c   :  { %2921 = vmatmul.mubr.msk.f32.vlgmr.msra.gmra.mrb[0].mxu1 %vm348_vm4, %v514_v31 }
 0x24d   :  { %2929 = vmatpush3.xpose.msk.msra.mxu1 %vm348_vm4, %v682_v30  ;;  %2930 = vmatprep.mubr.msk.f32.mxu1 %vm3401_vm1, %v3400_v2  ;;  %v1029_v30 = vld [vmem:[%s4098_s10 + $0x8] sm:$0xff] }
 0x24e   :  { %2938 = vmatprep.subr.mxu1 %v3400_v2  ;;  %v846_v34 = vpop.permute.xlu1 %845  ;;  %v3142_v31 = vpack.c.bf16 %v1029_v30, %v1028_v29  ;;  %v2697_v30 = vld [vmem:[%s4101_s13] ss:$0 sm:$0xff] }
 0x24f   :  { %v848_v33 = vpop.permute.xlu0 %847 }
 0x250   :  { %2931 = vmatmul.mubr.msk.f32.vlgmr.msra.gmra.mrb[2].mxu1 %vm348_vm4, %v680_v32  ;;  %v1030_v32 = vld [vmem:[%s4098_s10 + $0x10] sm:$0xff] }
 0x251   :  { %2939 = vmatpush3.xpose.msk.msra.mxu1 %vm348_vm4, %v848_v33  ;;  %2940 = vmatprep.mubr.msk.f32.mxu1 %vm3401_vm1, %v3400_v2  ;;  %v1031_v33 = vld [vmem:[%s4098_s10 + $0x18] sm:$0xff] }
 0x252   :  { %3141 = vmatprep.subr.bf16.mxu1 %v3402_v8 }
 0x254   :  { %2941 = vmatmul.mubr.msk.f32.vlgmr.msra.gmra.mrb[4].mxu1 %vm348_vm4, %v846_v34  ;;  %v3145_v34 = vpack.c.bf16 %v1031_v33, %v1030_v32  ;;  %v1242_v33 = vld [vmem:[%s4104_s16 + $0x70] sm:$0xff] }
 0x255   :  { %2956 = vmatprep.mubr.msk.f32.mxu1 %vm3401_vm1, %v3400_v2  ;;  %3143 = vmatpush3.bf16.msra.mxu1 %v3142_v31 }
 0x256   :  { %3144 = vmatprep.subr.bf16.mxu1 %v3402_v8 }
 0x259   :  { %3146 = vmatpush3.bf16.msra.mxu1 %v3145_v34  ;;  %v1243_v34 = vld [vmem:[%s4104_s16 + $0x78] sm:$0xff] }
 0x25a   :  { %3153 = vmatprep.subr.bf16.mxu1 %v3402_v8 }
 0x2ab   :  { %v421_v35 = vpop.f32.mrb[6].mxu0 }
 0x2ac   :  { %v425_v36 = vmul.f32 0.35355338, %v421_v35  ;;  %v2912_v37 = vpop.f32.mrb[7].mxu0 }
 0x2ae   :  { %v426_v38 = vsel %vm348_vm4, %v425_v36, -inf }
 0x2af   :  { %427 = vmax.xlane.f32.xlu0 %v426_v38 }
 0x31f   :  { %v587_v39 = vpop.f32.mrb[0].mxu1 }
 0x320   :  { %v591_v40 = vmul.f32 0.35355338, %v587_v39  ;;  %v2922_v41 = vpop.f32.mrb[1].mxu1 }
 0x322   :  { %v592_v42 = vsel %vm348_vm4, %v591_v40, -inf }
 0x323   :  { %593 = vmax.xlane.f32.xlu1 %v592_v42  ;;  %v753_v43 = vpop.f32.mrb[2].mxu1 }
 0x324   :  { %v757_v44 = vmul.f32 0.35355338, %v753_v43  ;;  %v2932_v45 = vpop.f32.mrb[3].mxu1 }
 0x326   :  { %v758_v46 = vsel %vm348_vm4, %v757_v44, -inf }
 0x327   :  { %v919_v47 = vpop.f32.mrb[4].mxu1  ;;  %759 = vmax.xlane.f32.xlu0 %v758_v46 }
 0x328   :  { %v923_v48 = vmul.f32 0.35355338, %v919_v47  ;;  %v2942_v49 = vpop.f32.mrb[5].mxu1  ;;  %v2694_v47 = vld [vmem:[%s4099_s11] ss:$0 sm:$0xff] }
 0x32a   :  { %v924_v50 = vsel %vm348_vm4, %v923_v48, -inf }
 0x32b   :  { %925 = vmax.xlane.f32.xlu0 %v924_v50 }
 0x334   :  { %437 = vrot.lane.b32.xlu1 %v3606_v25, %s3406_s4 }
 0x33c   :  { %v428_v51 = vpop.xlane.xlu0 %427 }
 0x33d   :  { %v429_v52 = vsub.f32 %v425_v36, %v428_v51 }
 0x33f   :  { %v430_v53 = vmul.f32 1.442695, %v429_v52 }
 0x341   :  { %3245 = vpow2.f32 %v430_v53 }
 0x34b   :  { %v3246_v54 = vpop.eup %3245 }
 0x34c   :  { %v432_v55 = vsel %vm348_vm4, %v3246_v54, 0.0 }
 0x358   :  { %433 = vadd.xlane.f32.xlu1 %v432_v55 }
 0x3b0   :  { %v594_v56 = vpop.xlane.xlu1 %593 }
 0x3b1   :  { %v595_v57 = vsub.f32 %v591_v40, %v594_v56 }
 0x3b3   :  { %v596_v58 = vmul.f32 1.442695, %v595_v57 }
 0x3b4   :  { %v438_v59 = vpop.permute.xlu1 %437  ;;  %v760_v60 = vpop.xlane.xlu0 %759 }
 0x3b5   :  { %3247 = vpow2.f32 %v596_v58  ;;  %v761_v61 = vsub.f32 %v757_v44, %v760_v60  ;;  %2914 = vmatpush3.msra.mxu0 %v438_v59  ;;  %v1143_v58 = vld [vmem:[%s4102_s14] sm:$0xff]  ;;  %v1144_v59 = vld [vmem:[%s4102_s14 + $0x8] sm:$0xff] }
 0x3b6   :  { %2923 = vmatprep.subr.mxu0 %v3400_v2  ;;  %v3148_v60 = vpack.c.bf16 %v1144_v59, %v1143_v58 }
 0x3b7   :  { %v762_v62 = vmul.f32 1.442695, %v761_v61  ;;  %v1146_v61 = vld [vmem:[%s4102_s14 + $0x18] sm:$0xff] }
 0x3b8   :  { %v926_v63 = vpop.xlane.xlu0 %925 }
 0x3b9   :  { %3249 = vpow2.f32 %v762_v62  ;;  %v927_v0 = vsub.f32 %v923_v48, %v926_v63  ;;  %v1228_v63 = vld [vmem:[%s4104_s16] sm:$0xff] }
 0x3bb   :  { %v928_v1 = vmul.f32 1.442695, %v927_v0  ;;  %v1229_v0 = vld [vmem:[%s4104_s16 + $0x8] sm:$0xff] }
 0x3bd   :  { %3251 = vpow2.f32 %v928_v1  ;;  %v1230_v1 = vld [vmem:[%s4104_s16 + $0x10] sm:$0xff] }
 0x3bf   :  { %v3248_v3 = vpop.eup %3247 }
 0x3c0   :  { %v598_v4 = vsel %vm348_vm4, %v3248_v3, 0.0 }
 0x3c1   :  { %599 = vadd.xlane.f32.xlu0 %v598_v4  ;;  %v1231_v4 = vld [vmem:[%s4104_s16 + $0x18] sm:$0xff] }
 0x3c3   :  { %v3250_v5 = vpop.eup %3249 }
 0x3c4   :  { %v764_v6 = vsel %vm348_vm4, %v3250_v5, 0.0 }
 0x3c5   :  { %765 = vadd.xlane.f32.xlu1 %v764_v6  ;;  %v1232_v6 = vld [vmem:[%s4104_s16 + $0x20] sm:$0xff] }
 0x3c7   :  { %v3252_v7 = vpop.eup %3251 }
 0x3c8   :  { %v930_v9 = vsel %vm348_vm4, %v3252_v7, 0.0 }
 0x3c9   :  { %931 = vadd.xlane.f32.xlu0 %v930_v9 }
 0x3d6   :  { %769 = vrot.lane.b32.xlu1 %v3606_v25, %s4114_s30  ;;  %s4138_s30 = smov 8  }
 0x3da   :  { %935 = vrot.lane.b32.xlu1 %v3606_v25, %s4115_s24 }
 0x3df   :  { %603 = vrot.lane.b32.xlu0 %v3606_v25, %s4119_s25 }
 0x3e5   :  { %v434_v10 = vpop.xlane.xlu1 %433 }
 0x3e6   :  { %3253 = vrcp.f32 %v434_v10  ;;  %v1234_v10 = vld [vmem:[%s4104_s16 + $0x30] sm:$0xff] }
 0x3f0   :  { %v3254_v11 = vpop.eup %3253 }
 0x3f1   :  { %v436_v13 = vmul.f32 %v3254_v11, %v3246_v54  ;;  %v1235_v11 = vld [vmem:[%s4104_s16 + $0x38] sm:$0xff] }
 0x3f3   :  { %2916 = vmatmul.mubr.msk.f32.vlgmr.msra.gmra.mrb[8].mxu0 %vm348_vm4, %v436_v13  ;;  %v3163_v13 = vpack.c.bf16 %v1235_v11, %v1234_v10 }
 0x3f4   :  { %2925 = vmatprep.mubr.msk.f32.mxu0 %vm3401_vm1, %v3400_v2 }
 0x44e   :  { %v600_v14 = vpop.xlane.xlu0 %599 }
 0x44f   :  { %3255 = vrcp.f32 %v600_v14  ;;  %v1236_v14 = vld [vmem:[%s4104_s16 + $0x40] sm:$0xff] }
 0x452   :  { %v766_v15 = vpop.xlane.xlu1 %765 }
 0x453   :  { %3257 = vrcp.f32 %v766_v15  ;;  %v1237_v15 = vld [vmem:[%s4104_s16 + $0x48] sm:$0xff] }
 0x456   :  { %v932_v16 = vpop.xlane.xlu0 %931  ;;  %v770_v20 = vpop.permute.xlu1 %769 }
 0x457   :  { %3259 = vrcp.f32 %v932_v16  ;;  %v3166_v16 = vpack.c.bf16 %v1237_v15, %v1236_v14  ;;  %v2708_v15 = vld [vmem:[%s4134_s7 + $0x1] ss:$0 sm:$0xff]  ;;  %s4136_s7 = smov 72  }
 0x459   :  { %v3256_v17 = vpop.eup %3255 }
 0x45a   :  { %v602_v18 = vmul.f32 %v3256_v17, %v3248_v3  ;;  %v604_v21 = vpop.permute.xlu0 %603  ;;  %v936_v24 = vpop.permute.xlu1 %935  ;;  %v3154_v3 = vpack.c.bf16 %v1229_v0, %v1228_v63  ;;  %v1238_v17 = vld [vmem:[%s4104_s16 + $0x50] sm:$0xff]  ;;  %v2710_v63 = vld [vmem:[%s4096_s8 + $0x20] sm:$0xff]  ;;  %v2711_v0 = vld [vmem:[%s4096_s8 + $0x28] sm:$0xff] }
 0x45b   :  { %2924 = vmatpush3.msra.mxu0 %v604_v21  ;;  %v1240_v21 = vld [vmem:[%s4104_s16 + $0x60] sm:$0xff] }
 0x45c   :  { %2926 = vmatmul.mubr.msk.f32.vlgmr.msra.gmra.mrb[10].mxu0 %vm348_vm4, %v602_v18  ;;  %2933 = vmatprep.subr.mxu0 %v3400_v2  ;;  %v1239_v18 = vld [vmem:[%s4104_s16 + $0x58] sm:$0xff] }
 0x45d   :  { %v3258_v22 = vpop.eup %3257  ;;  %2934 = vmatpush3.msra.mxu0 %v770_v20  ;;  %2935 = vmatprep.mubr.msk.f32.mxu0 %vm3401_vm1, %v3400_v2  ;;  %v3169_v20 = vpack.c.bf16 %v1239_v18, %v1238_v17 }
 0x45e   :  { %v768_v23 = vmul.f32 %v3258_v22, %v3250_v5  ;;  %2943 = vmatprep.subr.mxu0 %v3400_v2  ;;  %v3157_v5 = vpack.c.bf16 %v1231_v4, %v1230_v1  ;;  %v1241_v22 = vld [vmem:[%s4104_s16 + $0x68] sm:$0xff]  ;;  %v2702_v1 = vld [vmem:[%s4107_s19] ss:$0 sm:$0xff]  ;;  %v3184_v4 = vpack.c.bf16 %v2711_v0, %v2710_v63 }
 0x460   :  { %2936 = vmatmul.mubr.msk.f32.vlgmr.msra.gmra.mrb[12].mxu0 %vm348_vm4, %v768_v23  ;;  %v3172_v23 = vpack.c.bf16 %v1241_v22, %v1240_v21 }
 0x461   :  { %v3260_v25 = vpop.eup %3259  ;;  %2944 = vmatpush3.msra.mxu0 %v936_v24  ;;  %2945 = vmatprep.mubr.msk.f32.mxu0 %vm3401_vm1, %v3400_v2 }
 0x462   :  { %v934_v26 = vmul.f32 %v3260_v25, %v3252_v7  ;;  %3147 = vmatprep.subr.bf16.mxu0 %v3402_v8  ;;  %v1233_v7 = vld [vmem:[%s4104_s16 + $0x28] sm:$0xff] }
 0x463   :  { %v3160_v9 = vpack.c.bf16 %v1233_v7, %v1232_v6  ;;  %v2712_v6 = vld [vmem:[%s4096_s8 + $0x30] sm:$0xff]  ;;  %v2713_v7 = vld [vmem:[%s4096_s8 + $0x38] sm:$0xff]  ;;  %s4140_s8 = smov 24  }
 0x464   :  { %2946 = vmatmul.mubr.msk.f32.vlgmr.msra.gmra.mrb[14].mxu0 %vm348_vm4, %v934_v26 }
 0x465   :  { %2967 = vmatprep.mubr.msk.f32.mxu0 %vm3401_vm1, %v3400_v2  ;;  %3149 = vmatpush3.bf16.msra.mxu0 %v3148_v60 }
 0x466   :  { %3150 = vmatprep.subr.bf16.mxu0 %v3402_v8 }
 0x4c6   :  { %v509_v27 = vpop.f32.mrb[8].mxu0 }
 0x4c7   :  { %v2917_v28 = vpop.f32.mrb[9].mxu0 }
 0x4c8   :  { %v2696_v28 = vld [vmem:[%s4100_s12] ss:$0 sm:$0xff] }
 0x52f   :  { %v675_v35 = vpop.f32.mrb[10].mxu0 }
 0x530   :  { %1012 = vrot.lane.b32.xlu0 %v675_v35, %s4118_s5  ;;  %v2927_v36 = vpop.f32.mrb[11].mxu0  ;;  %v3175_v35 = vpack.c.bf16 %v1243_v34, %v1242_v33 }
 0x531   :  { %v2698_v36 = vld [vmem:[%s4103_s15] ss:$0 sm:$0xff] }
 0x533   :  { %v841_v37 = vpop.f32.mrb[12].mxu0 }
 0x534   :  { %1016 = vrot.lane.b32.xlu1 %v841_v37, %s4117_s1  ;;  %v2937_v38 = vpop.f32.mrb[13].mxu0 }
 0x537   :  { %v1007_v39 = vpop.f32.mrb[14].mxu0 }
 0x538   :  { %1020 = vrot.lane.b32.xlu0 %v1007_v39, %s4116_s26  ;;  %v2947_v40 = vpop.f32.mrb[15].mxu0  ;;  %s4139_s26 = smov 16  }
 0x5a2   :  { %v1013_v41 = vpop.permute.xlu0 %1012 }
 0x5a3   :  { %v1023_v43 = vsel %vm348_vm4, %v509_v27, %v1013_v41  ;;  %v2700_v41 = vld [vmem:[%s4105_s17] ss:$0 sm:$0xff] }
 0x5a6   :  { %v1017_v42 = vpop.permute.xlu1 %1016 }
 0x5a7   :  { %v1025_v44 = vsel %vm1024_vm5, %v1023_v43, %v1017_v42 }
 0x5aa   :  { %v1021_v45 = vpop.permute.xlu0 %1020 }
 0x5ab   :  { %v1027_v46 = vsel %vm1026_vm6, %v1025_v44, %v1021_v45 }
 0x5ac   :  { %2957 = vmatmul.mubr.msk.f32.vlgmr.msra.gmra.mrb[6].mxu1 %vm190_vm3, %v1027_v46 }
 0x5ad   :  { %3002 = vmatprep.mubr.msk.f32.mxu1 %vm3401_vm1, %v3400_v2  ;;  %3155 = vmatpush3.bf16.msra.mxu1 %v3154_v3 }
 0x5ae   :  { %3156 = vmatprep.subr.bf16.mxu1 %v3402_v8 }
 0x5b1   :  { %3158 = vmatpush3.bf16.msra.mxu1 %v3157_v5 }
 0x5b2   :  { %3159 = vmatprep.subr.bf16.mxu1 %v3402_v8 }
 0x5b5   :  { %3161 = vmatpush3.bf16.msra.mxu1 %v3160_v9  ;;  %v3187_v9 = vpack.c.bf16 %v2713_v7, %v2712_v6 }
 0x5b6   :  { %3162 = vmatprep.subr.bf16.mxu1 %v3402_v8 }
 0x5b9   :  { %3164 = vmatpush3.bf16.msra.mxu1 %v3163_v13  ;;  %v2715_v13 = vld [vmem:[%s4097_s9 + $0x1] ss:$0 sm:$0xff]  ;;  %s4135_s9 = smov 88  }
 0x5ba   :  { %3165 = vmatprep.subr.bf16.mxu1 %v3402_v8 }
 0x5bd   :  { %3167 = vmatpush3.bf16.msra.mxu1 %v3166_v16 }
 0x5be   :  { %3168 = vmatprep.subr.bf16.mxu1 %v3402_v8 }
 0x5c1   :  { %3170 = vmatpush3.bf16.msra.mxu1 %v3169_v20 }
 0x5c2   :  { %3171 = vmatprep.subr.bf16.mxu1 %v3402_v8 }
 0x5c5   :  { %3173 = vmatpush3.bf16.msra.mxu1 %v3172_v23 }
 0x5c6   :  { %3174 = vmatprep.subr.bf16.mxu1 %v3402_v8 }
 0x5c9   :  { %3176 = vmatpush3.bf16.msra.mxu1 %v3175_v35 }
 0x5ca   :  { %3047 = vmatprep.subr.mxu1 %v3400_v2 }
 0x67f   :  { %v1108_v48 = vpop.f32.mrb[6].mxu1 }
 0x680   :  { %v1109_v49 = vadd.f32 %v2694_v47, %v1108_v48  ;;  %v2958_v50 = vpop.f32.mrb[7].mxu1 }
 0x682   :  { %v1112_v51 = vadd.f32 %v1109_v49, %v3577_v12  ;;  %v1145_v12 = vld [vmem:[%s4102_s14 + $0x10] sm:$0xff] }
 0x683   :  { %v3151_v62 = vpack.c.bf16 %v1146_v61, %v1145_v12  ;;  %v2701_v61 = vld [vmem:[%s4106_s18] ss:$0 sm:$0xff] }
 0x684   :  { %v1115_v52 = vsel %vm190_vm3, %v1112_v51, 0.0 }
 0x685   :  { %1116 = vadd.xlane.f32.xlu1 %v1115_v52  ;;  %3152 = vmatpush3.bf16.msra.mxu0 %v3151_v62  ;;  %v2703_v52 = vld [vmem:[%s4131_s0 + $0x20] sm:$0xff] }
 0x686   :  { %3177 = vmatprep.subr.bf16.mxu0 %v3402_v8 }
 0x712   :  { %v1117_v53 = vpop.xlane.xlu1 %1116 }
 0x713   :  { %v1119_v54 = vmul.f32 0.03125, %v1117_v53  ;;  %v2704_v53 = vld [vmem:[%s4131_s0 + $0x28] sm:$0xff] }
 0x715   :  { %v1120_v55 = vsub.f32 %v1112_v51, %v1119_v54  ;;  %v3178_v54 = vpack.c.bf16 %v2704_v53, %v2703_v52 }
 0x717   :  { %v1121_v56 = vmul.f32 %v1120_v55, %v1120_v55 }
 0x719   :  { %v1122_v57 = vsel %vm190_vm3, %v1121_v56, 0.0  ;;  %v2706_v56 = vld [vmem:[%s4131_s0 + $0x38] sm:$0xff] }
 0x71a   :  { %1123 = vadd.xlane.f32.xlu0 %v1122_v57 }
 0x7a7   :  { %v1124_v24 = vpop.xlane.xlu0 %1123 }
 0x7a8   :  { %v1125_v25 = vmul.f32 0.03125, %v1124_v24 }
 0x7aa   :  { %v1126_v26 = vadd.f32 1e-05, %v1125_v25 }
 0x7ac   :  { %3261 = vrsqrt.f32 %v1126_v26 }
 0x7b6   :  { %v3262_v27 = vpop.eup %3261 }
 0x7b7   :  { %v1128_v29 = vmul.f32 %v3262_v27, %v1120_v55  ;;  %v2705_v55 = vld [vmem:[%s4131_s0 + $0x30] sm:$0xff] }
 0x7b8   :  { %v3181_v57 = vpack.c.bf16 %v2706_v56, %v2705_v55 }
 0x7b9   :  { %v1135_v31 = vmul.f32 %v2696_v28, %v1128_v29 }
 0x7bb   :  { %v1142_v32 = vadd.f32 %v2697_v30, %v1135_v31 }
 0x7bd   :  { %2968 = vmatmul.mubr.msk.f32.vlgmr.msra.gmra.mrb[16].mxu0 %vm190_vm3, %v1142_v32 }
 0x7be   :  { %3013 = vmatprep.mubr.msk.f32.mxu0 %vm3401_vm1, %v3400_v2  ;;  %3179 = vmatpush3.bf16.msra.mxu0 %v3178_v54 }
 0x7bf   :  { %3180 = vmatprep.subr.bf16.mxu0 %v3402_v8 }
 0x7c2   :  { %3182 = vmatpush3.bf16.msra.mxu0 %v3181_v57 }
 0x7c3   :  { %3183 = vmatprep.subr.bf16.mxu0 %v3402_v8 }
 0x890   :  { %v1223_v37 = vpop.f32.mrb[16].mxu0 }
 0x891   :  { %v1224_v38 = vadd.f32 %v2698_v36, %v1223_v37  ;;  %v2969_v39 = vpop.f32.mrb[17].mxu0 }
 0x893   :  { %v1227_v40 = vmax.f32 %v1224_v38, 0.0 }
 0x895   :  { %3003 = vmatmul.mubr.f32.vlgmr.msra.gmra.mrb[8].mxu1 %v1227_v40 }
 0x896   :  { %3049 = vmatprep.mubr.msk.f32.mxu1 %vm3401_vm1, %v3400_v2 }
 0x968   :  { %v1317_v42 = vpop.f32.mrb[8].mxu1 }
 0x969   :  { %v1318_v43 = vadd.f32 %v2700_v41, %v1317_v42  ;;  %v3004_v44 = vpop.f32.mrb[9].mxu1 }
 0x96b   :  { %v1321_v45 = vadd.f32 %v1318_v43, %v1142_v32 }
 0x96d   :  { %v1324_v46 = vsel %vm190_vm3, %v1321_v45, 0.0 }
 0x96e   :  { %1325 = vadd.xlane.f32.xlu0 %v1324_v46 }
 0x9fb   :  { %v1326_v47 = vpop.xlane.xlu0 %1325 }
 0x9fc   :  { %v1327_v48 = vmul.f32 0.03125, %v1326_v47 }
 0x9fe   :  { %v1328_v49 = vsub.f32 %v1321_v45, %v1327_v48 }
 0xa00   :  { %v1329_v50 = vmul.f32 %v1328_v49, %v1328_v49 }
 0xa02   :  { %v1330_v51 = vsel %vm190_vm3, %v1329_v50, 0.0 }
 0xa03   :  { %1331 = vadd.xlane.f32.xlu1 %v1330_v51 }
 0xa90   :  { %v1332_v58 = vpop.xlane.xlu1 %1331 }
 0xa91   :  { %v1333_v59 = vmul.f32 0.03125, %v1332_v58 }
 0xa93   :  { %v1334_v60 = vadd.f32 1e-05, %v1333_v59 }
 0xa95   :  { %3263 = vrsqrt.f32 %v1334_v60 }
 0xa9f   :  { %v3264_v12 = vpop.eup %3263 }
 0xaa0   :  { %v1336_v62 = vmul.f32 %v3264_v12, %v1328_v49 }
 0xaa2   :  { %v1343_v3 = vmul.f32 %v2701_v61, %v1336_v62 }
 0xaa4   :  { %v3817_v5 = vadd.f32 %v2702_v1, %v1343_v3 }
 0xaa6   :  { %3014 = vmatmul.mubr.msk.f32.vlgmr.msra.gmra.mrb[18].mxu0 %vm190_vm3, %v3817_v5 }
 0xaa7   :  { %3185 = vmatpush3.bf16.msra.mxu0 %v3184_v4  ;;  %3024 = vmatprep.mubr.msk.f32.mxu0 %vm3401_vm1, %v3400_v2 }
 0xaa8   :  { %3186 = vmatprep.subr.bf16.mxu0 %v3402_v8 }
 0xaab   :  { %3188 = vmatpush3.bf16.msra.mxu0 %v3187_v9 }
 0xaac   :  { %3027 = vmatprep.subr.mxu0 %v3400_v2 }
 0xaae   :  { %3025 = vmatmul.mubr.msk.f32.vlgmr.msra.gmra.mrb[20].mxu0 %vm190_vm3, %v3595_v19 }
 0xaaf   :  { %3029 = vmatprep.mubr.msk.f32.mxu0 %vm3401_vm1, %v3400_v2 }
 0xb79   :  { %v1433_v10 = vpop.f32.mrb[18].mxu0 }
 0xb7a   :  { %v3015_v11 = vpop.f32.mrb[19].mxu0  ;;  %v1434_v18 = vadd.f32 %v2708_v15, %v1433_v10 }
 0xb81   :  { %v1516_v14 = vpop.f32.mrb[20].mxu0 }
 0xb82   :  { %v3841_v16 = vadd.f32 %v2715_v13, %v1516_v14  ;;  %v3026_v17 = vpop.f32.mrb[21].mxu0 }
 0xb84   :  { %1686 = vrot.lane.b32.xlu1 %v3841_v16, %s3404_s29  ;;  %3028 = vmatpush3.xpose.msk.msra.mxu0 %vm348_vm4, %v3841_v16 }
 0xb85   :  { %3032 = vmatprep.subr.mxu0 %v3400_v2 }
 0xb87   :  { %3030 = vmatmul.mubr.msk.f32.vlgmr.msra.gmra.mrb[22].mxu0 %vm348_vm4, %v1434_v18 }
 0xb88   :  { %1684 = vrot.lane.b32.xlu1 %v1434_v18, %s3404_s29  ;;  %3034 = vmatprep.mubr.msk.f32.mxu0 %vm3401_vm1, %v3400_v2  ;;  %s4141_s29 = sld [smem:[#allocation17_spill]] }
 0xbf6   :  { %v1687_v31 = vpop.permute.xlu1 %1686 }
 0xbfa   :  { %v1685_v32 = vpop.permute.xlu1 %1684 }
 0xc5a   :  { %v1592_v20 = vpop.f32.mrb[22].mxu0 }
 0xc5b   :  { %v1596_v21 = vmul.f32 0.35355338, %v1592_v20  ;;  %v3031_v22 = vpop.f32.mrb[23].mxu0  ;;  %v2729_v20 = vld [vmem:[%s4098_s10 + $0x20] sm:$0xff] }
 0xc5d   :  { %v1597_v23 = vsel %vm348_vm4, %v1596_v21, -inf }
 0xc5e   :  { %1598 = vmax.xlane.f32.xlu0 %v1597_v23  ;;  %v2731_v23 = vld [vmem:[%s4098_s10 + $0x30] sm:$0xff] }
 0xc74   :  { %1608 = vrot.lane.b32.xlu0 %v3841_v16, %s3406_s4 }
 0xc78   :  { %1852 = vrot.lane.b32.xlu0 %v3841_v16, %s3403_s28 }
 0xc7c   :  { %2018 = vrot.lane.b32.xlu0 %v3841_v16, %s3405_s3 }
 0xceb   :  { %v1599_v24 = vpop.xlane.xlu0 %1598 }
 0xcec   :  { %v1600_v25 = vsub.f32 %v1596_v21, %v1599_v24  ;;  %v2730_v21 = vld [vmem:[%s4098_s10 + $0x28] sm:$0xff]  ;;  %v2732_v24 = vld [vmem:[%s4098_s10 + $0x38] sm:$0xff] }
 0xced   :  { %v3190_v22 = vpack.c.bf16 %v2730_v21, %v2729_v20  ;;  %v2739_v21 = vld [vmem:[%s4101_s13 + $0x1] ss:$0 sm:$0xff] }
 0xcee   :  { %v1601_v26 = vmul.f32 1.442695, %v1600_v25  ;;  %v3193_v25 = vpack.c.bf16 %v2732_v24, %v2731_v23  ;;  %v2762_v24 = vld [vmem:[%s4104_s16 + $0xf8] sm:$0xff] }
 0xcef   :  { %v1609_v27 = vpop.permute.xlu0 %1608 }
 0xcf0   :  { %3265 = vpow2.f32 %v1601_v26  ;;  %3033 = vmatpush3.msra.mxu0 %v1609_v27 }
 0xcf1   :  { %3037 = vmatprep.subr.mxu0 %v3400_v2 }
 0xcf3   :  { %v1853_v28 = vpop.permute.xlu0 %1852 }
 0xcf4   :  { %3048 = vmatpush3.xpose.msk.msra.mxu1 %vm348_vm4, %v1853_v28 }
 0xcf5   :  { %3057 = vmatprep.subr.mxu1 %v3400_v2 }
 0xcf7   :  { %v2019_v35 = vpop.permute.xlu0 %2018 }
 0xcfa   :  { %v3266_v29 = vpop.eup %3265 }
 0xcfb   :  { %v1603_v30 = vsel %vm348_vm4, %v3266_v29, 0.0 }
 0xcfc   :  { %1604 = vadd.xlane.f32.xlu1 %v1603_v30 }
 0xd0d   :  { %1850 = vrot.lane.b32.xlu1 %v1434_v18, %s3403_s28  ;;  %s4137_s28 = smov 80  }
 0xd11   :  { %2016 = vrot.lane.b32.xlu1 %v1434_v18, %s3405_s3  ;;  %s87_s3 = sld [smem:[#allocation3 + %s4141_s29]] }
 0xd89   :  { %v1605_v33 = vpop.xlane.xlu1 %1604 }
 0xd8a   :  { %3267 = vrcp.f32 %v1605_v33 }
 0xd8d   :  { %v1851_v34 = vpop.permute.xlu1 %1850 }
 0xd8e   :  { %3050 = vmatmul.mubr.msk.f32.vlgmr.msra.gmra.mrb[10].mxu1 %vm348_vm4, %v1851_v34 }
 0xd8f   :  { %3058 = vmatpush3.xpose.msk.msra.mxu1 %vm348_vm4, %v2019_v35  ;;  %3059 = vmatprep.mubr.msk.f32.mxu1 %vm3401_vm1, %v3400_v2 }
 0xd90   :  { %3189 = vmatprep.subr.bf16.mxu1 %v3402_v8 }
 0xd91   :  { %v2017_v36 = vpop.permute.xlu1 %2016 }
 0xd92   :  { %3060 = vmatmul.mubr.msk.f32.vlgmr.msra.gmra.mrb[12].mxu1 %vm348_vm4, %v2017_v36 }
 0xd93   :  { %3075 = vmatprep.mubr.msk.f32.mxu1 %vm3401_vm1, %v3400_v2  ;;  %3191 = vmatpush3.bf16.msra.mxu1 %v3190_v22 }
 0xd94   :  { %v3268_v37 = vpop.eup %3267  ;;  %3192 = vmatprep.subr.bf16.mxu1 %v3402_v8 }
 0xd95   :  { %v1607_v38 = vmul.f32 %v3268_v37, %v3266_v29 }
 0xd97   :  { %3035 = vmatmul.mubr.msk.f32.vlgmr.msra.gmra.mrb[24].mxu0 %vm348_vm4, %v1607_v38  ;;  %3194 = vmatpush3.bf16.msra.mxu1 %v3193_v25  ;;  %v2734_v38 = vld [vmem:[%s4099_s11 + $0x1] ss:$0 sm:$0xff] }
 0xd98   :  { %3038 = vmatpush3.xpose.msk.msra.mxu0 %vm348_vm4, %v1687_v31  ;;  %3039 = vmatprep.mubr.msk.f32.mxu0 %vm3401_vm1, %v3400_v2 }
 0xd99   :  { %3042 = vmatprep.subr.mxu0 %v3400_v2  ;;  %3201 = vmatprep.subr.bf16.mxu1 %v3402_v8 }
 0xd9b   :  { %3040 = vmatmul.mubr.msk.f32.vlgmr.msra.gmra.mrb[26].mxu0 %vm348_vm4, %v1685_v32 }
 0xd9c   :  { %3044 = vmatprep.mubr.msk.f32.mxu0 %vm3401_vm1, %v3400_v2 }
 0xe61   :  { %v1924_v39 = vpop.f32.mrb[10].mxu1 }
 0xe62   :  { %v1928_v40 = vmul.f32 0.35355338, %v1924_v39  ;;  %v3051_v41 = vpop.f32.mrb[11].mxu1 }
 0xe64   :  { %v1929_v42 = vsel %vm348_vm4, %v1928_v40, -inf }
 0xe65   :  { %1930 = vmax.xlane.f32.xlu1 %v1929_v42  ;;  %v2090_v43 = vpop.f32.mrb[12].mxu1 }
 0xe66   :  { %v3061_v44 = vpop.f32.mrb[13].mxu1  ;;  %v2094_v50 = vmul.f32 0.35355338, %v2090_v43 }
 0xe68   :  { %v2095_v52 = vsel %vm348_vm4, %v2094_v50, -inf }
 0xe6a   :  { %v3882_v45 = vpop.f32.mrb[24].mxu0 }
 0xe6b   :  { %v3036_v46 = vpop.f32.mrb[25].mxu0 }
 0xe6e   :  { %v1758_v47 = vpop.f32.mrb[26].mxu0 }
 0xe6f   :  { %v1762_v48 = vmul.f32 0.35355338, %v1758_v47  ;;  %v3041_v49 = vpop.f32.mrb[27].mxu0 }
 0xe70   :  { %v2740_v49 = vld [vmem:[%s4102_s14 + $0x20] sm:$0xff] }
 0xe71   :  { %v1763_v51 = vsel %vm348_vm4, %v1762_v48, -inf }
 0xe72   :  { %1764 = vmax.xlane.f32.xlu0 %v1763_v51 }
 0xe76   :  { %2096 = vmax.xlane.f32.xlu0 %v2095_v52  ;;  %v2743_v52 = vld [vmem:[%s4102_s14 + $0x38] sm:$0xff] }
 0xef2   :  { %v1931_v53 = vpop.xlane.xlu1 %1930 }
 0xef3   :  { %v1932_v54 = vsub.f32 %v1928_v40, %v1931_v53 }
 0xef5   :  { %v1933_v55 = vmul.f32 1.442695, %v1932_v54  ;;  %v2747_v54 = vld [vmem:[%s4104_s16 + $0x80] sm:$0xff] }
 0xef7   :  { %3269 = vpow2.f32 %v1933_v55  ;;  %v2748_v55 = vld [vmem:[%s4104_s16 + $0x88] sm:$0xff] }
 0xeff   :  { %v1765_v56 = vpop.xlane.xlu0 %1764 }
 0xf00   :  { %v1766_v58 = vsub.f32 %v1762_v48, %v1765_v56  ;;  %v2749_v56 = vld [vmem:[%s4104_s16 + $0x90] sm:$0xff] }
 0xf01   :  { %v3270_v57 = vpop.eup %3269 }
 0xf02   :  { %v1935_v59 = vsel %vm348_vm4, %v3270_v57, 0.0  ;;  %v1767_v61 = vmul.f32 1.442695, %v1766_v58  ;;  %v2750_v58 = vld [vmem:[%s4104_s16 + $0x98] sm:$0xff] }
 0xf03   :  { %1936 = vadd.xlane.f32.xlu1 %v1935_v59  ;;  %v2097_v60 = vpop.xlane.xlu0 %2096  ;;  %v3205_v59 = vpack.c.bf16 %v2750_v58, %v2749_v56 }
 0xf04   :  { %v2098_v12 = vsub.f32 %v2094_v50, %v2097_v60  ;;  %v2741_v50 = vld [vmem:[%s4102_s14 + $0x28] sm:$0xff]  ;;  %v2751_v60 = vld [vmem:[%s4104_s16 + $0xa0] sm:$0xff] }
 0xf05   :  { %v3196_v51 = vpack.c.bf16 %v2741_v50, %v2740_v49  ;;  %v2768_v49 = vld [vmem:[%s4107_s19 + $0x1] ss:$0 sm:$0xff] }
 0xf06   :  { %v2099_v62 = vmul.f32 1.442695, %v2098_v12  ;;  %v2752_v12 = vld [vmem:[%s4104_s16 + $0xa8] sm:$0xff] }
 0xf08   :  { %3271 = vpow2.f32 %v2099_v62  ;;  %v2753_v62 = vld [vmem:[%s4104_s16 + $0xb0] sm:$0xff] }
 0xf09   :  { %3273 = vpow2.f32 %v1767_v61  ;;  %v3208_v61 = vpack.c.bf16 %v2752_v12, %v2751_v60 }
 0xf12   :  { %v3272_v63 = vpop.eup %3271 }
 0xf13   :  { %v2101_v0 = vsel %vm348_vm4, %v3272_v63, 0.0  ;;  %v3274_v1 = vpop.eup %3273 }
 0xf14   :  { %1774 = vrot.lane.b32.xlu1 %v3841_v16, %s4135_s9  ;;  %2102 = vadd.xlane.f32.xlu0 %v2101_v0  ;;  %v1769_v3 = vsel %vm348_vm4, %v3274_v1, 0.0 }
 0xf18   :  { %2106 = vrot.lane.b32.xlu1 %v3841_v16, %s4136_s7  ;;  %1770 = vadd.xlane.f32.xlu0 %v1769_v3  ;;  %v2756_v3 = vld [vmem:[%s4104_s16 + $0xc8] sm:$0xff] }
 0xf2e   :  { %1940 = vrot.lane.b32.xlu0 %v3841_v16, %s4137_s28 }
 0xf90   :  { %v1937_v4 = vpop.xlane.xlu1 %1936 }
 0xf94   :  { %v1775_v6 = vpop.permute.xlu1 %1774 }
 0xf95   :  { %3043 = vmatpush3.msra.mxu0 %v1775_v6  ;;  %v2757_v6 = vld [vmem:[%s4104_s16 + $0xd0] sm:$0xff] }
 0xf96   :  { %3052 = vmatprep.subr.mxu0 %v3400_v2 }
 0xf98   :  { %v2107_v17 = vpop.permute.xlu1 %2106 }
 0xfa1   :  { %v2103_v7 = vpop.xlane.xlu0 %2102 }
 0xfa5   :  { %v1771_v9 = vpop.xlane.xlu0 %1770 }
 0xfa6   :  { %3275 = vrcp.f32 %v1771_v9 }
 0xfa7   :  { %3277 = vrcp.f32 %v1937_v4 }
 0xfa8   :  { %3279 = vrcp.f32 %v2103_v7  ;;  %v2758_v7 = vld [vmem:[%s4104_s16 + $0xd8] sm:$0xff] }
 0xfa9   :  { %v1941_v14 = vpop.permute.xlu0 %1940  ;;  %v3217_v9 = vpack.c.bf16 %v2758_v7, %v2757_v6 }
 0xfb0   :  { %v3276_v10 = vpop.eup %3275 }
 0xfb1   :  { %v1773_v11 = vmul.f32 %v3276_v10, %v3274_v1  ;;  %v3278_v13 = vpop.eup %3277  ;;  %v2755_v1 = vld [vmem:[%s4104_s16 + $0xc0] sm:$0xff] }
 0xfb2   :  { %v1939_v15 = vmul.f32 %v3278_v13, %v3270_v57  ;;  %v3280_v16 = vpop.eup %3279  ;;  %v3202_v57 = vpack.c.bf16 %v2748_v55, %v2747_v54  ;;  %v3214_v4 = vpack.c.bf16 %v2756_v3, %v2755_v1  ;;  %v2759_v10 = vld [vmem:[%s4104_s16 + $0xe0] sm:$0xff] }
 0xfb3   :  { %3045 = vmatmul.mubr.msk.f32.vlgmr.msra.gmra.mrb[28].mxu0 %vm348_vm4, %v1773_v11  ;;  %v2105_v18 = vmul.f32 %v3280_v16, %v3272_v63  ;;  %v2754_v63 = vld [vmem:[%s4104_s16 + $0xb8] sm:$0xff]  ;;  %v2760_v11 = vld [vmem:[%s4104_s16 + $0xe8] sm:$0xff] }
 0xfb4   :  { %3053 = vmatpush3.msra.mxu0 %v1941_v14  ;;  %3054 = vmatprep.mubr.msk.f32.mxu0 %vm3401_vm1, %v3400_v2  ;;  %v3211_v0 = vpack.c.bf16 %v2754_v63, %v2753_v62  ;;  %v3220_v13 = vpack.c.bf16 %v2760_v11, %v2759_v10 }
 0xfb5   :  { %3062 = vmatprep.subr.mxu0 %v3400_v2 }
 0xfb7   :  { %3055 = vmatmul.mubr.msk.f32.vlgmr.msra.gmra.mrb[30].mxu0 %vm348_vm4, %v1939_v15 }
 0xfb8   :  { %3063 = vmatpush3.msra.mxu0 %v2107_v17  ;;  %3064 = vmatprep.mubr.msk.f32.mxu0 %vm3401_vm1, %v3400_v2 }
 0xfb9   :  { %3195 = vmatprep.subr.bf16.mxu0 %v3402_v8 }
 0xfbb   :  { %3065 = vmatmul.mubr.msk.f32.vlgmr.msra.gmra.mrb[32].mxu0 %vm348_vm4, %v2105_v18  ;;  %v2738_v18 = vld [vmem:[%s4100_s12 + $0x1] ss:$0 sm:$0xff] }
 0xfbc   :  { %3086 = vmatprep.mubr.msk.f32.mxu0 %vm3401_vm1, %v3400_v2  ;;  %3197 = vmatpush3.bf16.msra.mxu0 %v3196_v51 }
 0xfbd   :  { %3198 = vmatprep.subr.bf16.mxu0 %v3402_v8 }
0x1086   :  { %v1846_v26 = vpop.f32.mrb[28].mxu0 }
0x1087   :  { %2183 = vrot.lane.b32.xlu1 %v1846_v26, %s4138_s30  ;;  %v3046_v27 = vpop.f32.mrb[29].mxu0  ;;  %v2745_v26 = vld [vmem:[%s4103_s15 + $0x1] ss:$0 sm:$0xff] }
0x108a   :  { %v2012_v28 = vpop.f32.mrb[30].mxu0 }
0x108b   :  { %2187 = vrot.lane.b32.xlu0 %v2012_v28, %s4139_s26  ;;  %v3056_v29 = vpop.f32.mrb[31].mxu0 }
0x108e   :  { %v2178_v30 = vpop.f32.mrb[32].mxu0 }
0x108f   :  { %2191 = vrot.lane.b32.xlu1 %v2178_v30, %s4140_s8  ;;  %v3066_v31 = vpop.f32.mrb[33].mxu0 }
0x10f9   :  { %v2184_v32 = vpop.permute.xlu1 %2183 }
0x10fa   :  { %v2194_v34 = vsel %vm348_vm4, %v3882_v45, %v2184_v32 }
0x10fd   :  { %v2188_v33 = vpop.permute.xlu0 %2187 }
0x10fe   :  { %v2195_v35 = vsel %vm1024_vm5, %v2194_v34, %v2188_v33 }
0x1101   :  { %v2192_v36 = vpop.permute.xlu1 %2191 }
0x1102   :  { %v2196_v37 = vsel %vm1026_vm6, %v2195_v35, %v2192_v36 }
0x1103   :  { %3076 = vmatmul.mubr.msk.f32.vlgmr.msra.gmra.mrb[14].mxu1 %vm190_vm3, %v2196_v37 }
0x1104   :  { %3121 = vmatprep.mubr.msk.f32.mxu1 %vm3401_vm1, %v3400_v2  ;;  %3203 = vmatpush3.bf16.msra.mxu1 %v3202_v57 }
0x1105   :  { %3204 = vmatprep.subr.bf16.mxu1 %v3402_v8 }
0x1108   :  { %3206 = vmatpush3.bf16.msra.mxu1 %v3205_v59 }
0x1109   :  { %3207 = vmatprep.subr.bf16.mxu1 %v3402_v8 }
0x110c   :  { %3209 = vmatpush3.bf16.msra.mxu1 %v3208_v61 }
0x110d   :  { %3210 = vmatprep.subr.bf16.mxu1 %v3402_v8 }
0x1110   :  { %3212 = vmatpush3.bf16.msra.mxu1 %v3211_v0 }
0x1111   :  { %3213 = vmatprep.subr.bf16.mxu1 %v3402_v8 }
0x1114   :  { %3215 = vmatpush3.bf16.msra.mxu1 %v3214_v4 }
0x1115   :  { %3216 = vmatprep.subr.bf16.mxu1 %v3402_v8 }
0x1118   :  { %3218 = vmatpush3.bf16.msra.mxu1 %v3217_v9 }
0x1119   :  { %3219 = vmatprep.subr.bf16.mxu1 %v3402_v8 }
0x111c   :  { %3221 = vmatpush3.bf16.msra.mxu1 %v3220_v13 }
0x111d   :  { %3222 = vmatprep.subr.bf16.mxu1 %v3402_v8  ;;  %v2761_v8 = vld [vmem:[%s4104_s16 + $0xf0] sm:$0xff] }
0x111e   :  { %v3223_v25 = vpack.c.bf16 %v2762_v24, %v2761_v8 }
0x1120   :  { %3224 = vmatpush3.bf16.msra.mxu1 %v3223_v25 }
0x11d6   :  { %v2279_v39 = vpop.f32.mrb[14].mxu1 }
0x11d7   :  { %v2280_v40 = vadd.f32 %v2734_v38, %v2279_v39  ;;  %v3077_v41 = vpop.f32.mrb[15].mxu1 }
0x11d8   :  { %v88_v41 = vstv %s87_s3 }
0x11d9   :  { %v2283_v42 = vadd.f32 %v2280_v40, %v3817_v5  ;;  %v2742_v5 = vld [vmem:[%s4102_s14 + $0x30] sm:$0xff] }
0x11da   :  { %v3199_v53 = vpack.c.bf16 %v2743_v52, %v2742_v5 }
0x11db   :  { %v2288_v43 = vsel %vm190_vm3, %v2283_v42, 0.0 }
0x11dc   :  { %2289 = vadd.xlane.f32.xlu0 %v2288_v43  ;;  %3200 = vmatpush3.bf16.msra.mxu0 %v3199_v53 }
0x11dd   :  { %3124 = vmatprep.subr.mxu0 %v3400_v2 }
0x1269   :  { %v2290_v44 = vpop.xlane.xlu0 %2289 }
0x126a   :  { %v2291_v45 = vmul.f32 0.03125, %v2290_v44 }
0x126c   :  { %v2292_v46 = vsub.f32 %v2283_v42, %v2291_v45 }
0x126e   :  { %v2293_v47 = vmul.f32 %v2292_v46, %v2292_v46 }
0x1270   :  { %v2294_v48 = vsel %vm190_vm3, %v2293_v47, 0.0  ;;  %v2767_v47 = vld [vmem:[%s4106_s18 + $0x1] ss:$0 sm:$0xff]  ;;  %s3413_s18 = smov [#allocation6]  }
0x1271   :  { %2295 = vadd.xlane.f32.xlu1 %v2294_v48  ;;  %s2625_s19 = sshll.u32 %s3413_s18, 4  ;;  %s2626_s19 = int_to_ptr.vmem [resolvable:$true] %s2625_s19 }
0x1272   :  { %s3303_s6 = scalar_lea.vmem %s2626_s19, 128  ;;  %p3308_p6 = scmp.lt.s32.totalorder %s2626_s19, %s2626_s19 }
0x1273   :  { %p3304_p5 = scmp.ne.s32.totalorder %s2626_s19, %s3303_s6  ;;  %p3309_p7 = scmp.lt.s32.totalorder %s3303_s6, %s3303_s6 }
0x1275   :  { %p3310_p8 = por %p3309_p7, %p3308_p6 }
0x1277   :  { %p3311_p9 = pnand %p3310_p8, %p3304_p5 }
0x12fe   :  { %v2296_v14 = vpop.xlane.xlu1 %2295 }
0x12ff   :  { %v2297_v15 = vmul.f32 0.03125, %v2296_v14 }
0x1301   :  { %v2298_v16 = vadd.f32 1e-05, %v2297_v15 }
0x1303   :  { %3281 = vrsqrt.f32 %v2298_v16 }
0x1304   :  { %3283 = vrcp.f32 %v88_v41 }
0x130d   :  { %v3282_v17 = vpop.eup %3281 }
0x130e   :  { %v2300_v20 = vmul.f32 %v3282_v17, %v2292_v46  ;;  %v3284_v42 = vpop.eup %3283 }
0x130f   :  { %3225 = vpush %v3284_v42 }
0x1310   :  { %v2307_v22 = vmul.f32 %v2738_v18, %v2300_v20 }
0x1312   :  { %v2314_v23 = vadd.f32 %v2739_v21, %v2307_v22 }
0x1314   :  { %3087 = vmatmul.mubr.msk.f32.vlgmr.msra.gmra.mrb[34].mxu0 %vm190_vm3, %v2314_v23 }
0x1315   :  { %3126 = vmatprep.mubr.msk.f32.mxu0 %vm3401_vm1, %v3400_v2  ;;  %v2764_v2 = vld [vmem:[%s4105_s17 + $0x1] ss:$0 sm:$0xff] }
0x1340   :  { %s3226_s2 = spop %3225 }
0x1341   :  { %v2602_v5 = vstv %s3226_s2 }
0x13e7   :  { %v2397_v27 = vpop.f32.mrb[34].mxu0 }
0x13e8   :  { %v2398_v28 = vadd.f32 %v2745_v26, %v2397_v27  ;;  %v3088_v29 = vpop.f32.mrb[35].mxu0 }
0x13ea   :  { %v2401_v30 = vmax.f32 %v2398_v28, 0.0 }
0x13ec   :  { %3122 = vmatmul.mubr.f32.vlgmr.msra.gmra.mrb[16].mxu1 %v2401_v30 }
0x14bf   :  { %v2493_v31 = vpop.f32.mrb[16].mxu1 }
0x14c0   :  { %v2494_v32 = vadd.f32 %v2764_v2, %v2493_v31  ;;  %v3123_v33 = vpop.f32.mrb[17].mxu1 }
0x14c2   :  { %v2497_v34 = vadd.f32 %v2494_v32, %v2314_v23 }
0x14c4   :  { %v2502_v35 = vsel %vm190_vm3, %v2497_v34, 0.0 }
0x14c5   :  { %2503 = vadd.xlane.f32.xlu0 %v2502_v35 }
0x1552   :  { %v2504_v36 = vpop.xlane.xlu0 %2503 }
0x1553   :  { %v2505_v37 = vmul.f32 0.03125, %v2504_v36 }
0x1555   :  { %v2506_v38 = vsub.f32 %v2497_v34, %v2505_v37 }
0x1557   :  { %v2507_v39 = vmul.f32 %v2506_v38, %v2506_v38 }
0x1559   :  { %v2508_v40 = vsel %vm190_vm3, %v2507_v39, 0.0 }
0x155a   :  { %2509 = vadd.xlane.f32.xlu0 %v2508_v40 }
0x15e7   :  { %v2510_v43 = vpop.xlane.xlu0 %2509 }
0x15e8   :  { %v2511_v44 = vmul.f32 0.03125, %v2510_v43 }
0x15ea   :  { %v2512_v45 = vadd.f32 1e-05, %v2511_v44 }
0x15ec   :  { %3285 = vrsqrt.f32 %v2512_v45 }
0x15f6   :  { %v3286_v46 = vpop.eup %3285 }
0x15f7   :  { %v2514_v48 = vmul.f32 %v3286_v46, %v2506_v38 }
0x15f9   :  { %v2521_v50 = vmul.f32 %v2767_v47, %v2514_v48 }
0x15fb   :  { %v2528_v51 = vadd.f32 %v2768_v49, %v2521_v50 }
0x15fd   :  { %3125 = vmatpush3.xpose.msk.msra.mxu0 %vm190_vm3, %v2528_v51  ;;  %2605 = vst.msk [vmem:[#allocation10] sm:$0xff] %vm190_vm3, %v2528_v51 }
0x1600   :  { %3127 = vmatmul.mubr.msk.f32.vlgmr.msra.gmra.mrb[36].mxu0 %vm190_vm3, %v3595_v19 }
0x16d3   :  { %v2598_v52 = vpop.f32.mrb[36].mxu0 }
0x16d4   :  { %v2603_v53 = vmul.f32 %v2602_v5, %v2598_v52  ;;  %v3128_v54 = vpop.f32.mrb[37].mxu0 }
0x16d6   :  { %2606 = vst.msk [vmem:[#allocation6] sm:$0xff] %vm348_vm4, %v2603_v53  ;;  %v2607_v55 = vsel %vm348_vm4, %v2603_v53, -inf }
0x16d7   :  { %2608 = vmax.xlane.f32.xlu1 %v2607_v55 }
0x1764   :  { %v2609_v56 = vpop.xlane.xlu1 %2608 }
0x1765   :  { %v2610_v57 = vsub.f32 %v2603_v53, %v2609_v56 }
0x1767   :  { %v2611_v58 = vmul.f32 1.442695, %v2610_v57 }
0x1769   :  { %3287 = vpow2.f32 %v2611_v58 }
0x1773   :  { %v3288_v59 = vpop.eup %3287 }
0x1774   :  { %v2613_v60 = vsel %vm348_vm4, %v3288_v59, 0.0 }
0x1775   :  { %2614 = vadd.xlane.f32.xlu0 %v2613_v60 }
0x1776   :  { %3314 = shalt.err (!%p3311_p9)
}
0x1777   :  { %s3315_s30 = scalar_lea.hbm %s4108_s20, 128 }
0x1778   :  { %p3316_p10 = scmp.ne.s32.totalorder %s4108_s20, %s3315_s30  ;;  %p3319_p11 = scmp.lt.u32.totalorder %s3315_s30, %s4108_s20 }
0x177a   :  { %p3321_p12 = pnand %p3319_p11, %p3316_p10 }
0x177c   :  { %3324 = shalt.err (!%p3321_p12)
}
0x177d   :  { %2628 = dma.vmem_to_hbm [thread:$0]  %s2626_s19, 128, %s4108_s20, [#allocation4]  }
0x177e   :  { %s3414_s11 = smov [#allocation10]  }
0x177f   :  { %s2655_s9 = sshll.u32 %s3414_s11, 4  ;;  %s2656_s9 = int_to_ptr.vmem [resolvable:$true] %s2655_s9 }
0x1780   :  { %s3325_s12 = scalar_lea.vmem %s2656_s9, 128  ;;  %p3330_p0 = scmp.lt.s32.totalorder %s2656_s9, %s2656_s9 }
0x1781   :  { %p3326_p13 = scmp.ne.s32.totalorder %s2656_s9, %s3325_s12  ;;  %p3331_p1 = scmp.lt.s32.totalorder %s3325_s12, %s3325_s12 }
0x1783   :  { %p3332_p2 = por %p3331_p1, %p3330_p0 }
0x1785   :  { %p3333_p3 = pnand %p3332_p2, %p3326_p13 }
0x1787   :  { %3336 = shalt.err (!%p3333_p3)
}
0x1788   :  { %s3337_s28 = scalar_lea.hbm %s4111_s23, 128 }
0x1789   :  { %p3338_p4 = scmp.ne.s32.totalorder %s4111_s23, %s3337_s28  ;;  %p3341_p5 = scmp.lt.u32.totalorder %s3337_s28, %s4111_s23 }
0x178b   :  { %p3343_p6 = pnand %p3341_p5, %p3338_p4 }
0x178d   :  { %3346 = shalt.err (!%p3343_p6)
}
0x178e   :  { %2658 = dma.vmem_to_hbm [thread:$0]  %s2656_s9, 128, %s4111_s23, [#allocation11]  }
0x178f   :  { %s3415_s4 = smov [#allocation7]   ;;  %s3416_s1 = smov [#allocation9]  }
0x1790   :  { %s2635_s0 = sshll.u32 %s3415_s4, 4  ;;  %s2645_s2 = sshll.u32 %s3416_s1, 4  ;;  %s2636_s0 = int_to_ptr.vmem [resolvable:$true] %s2635_s0  ;;  %s2646_s2 = int_to_ptr.vmem [resolvable:$true] %s2645_s2 }
0x1791   :  { %s3347_s18 = scalar_lea.vmem %s2636_s0, 128  ;;  %p3352_p8 = scmp.lt.s32.totalorder %s2636_s0, %s2636_s0 }
0x1792   :  { %p3348_p7 = scmp.ne.s32.totalorder %s2636_s0, %s3347_s18  ;;  %p3353_p9 = scmp.lt.s32.totalorder %s3347_s18, %s3347_s18 }
0x1794   :  { %p3354_p10 = por %p3353_p9, %p3352_p8 }
0x1796   :  { %p3355_p11 = pnand %p3354_p10, %p3348_p7 }
0x1802   :  { %v2615_v19 = vpop.xlane.xlu0 %2614 }
0x1803   :  { %3289 = vrcp.f32 %v2615_v19 }
0x180d   :  { %v3290_v12 = vpop.eup %3289 }
0x180e   :  { %v2617_v61 = vmul.f32 %v3290_v12, %v3288_v59 }
0x1810   :  { %2618 = vst.msk [vmem:[#allocation7] sm:$0xff] %vm348_vm4, %v2617_v61 }
0x1811   :  { %3358 = shalt.err (!%p3355_p11)
}
0x1812   :  { %s3359_s6 = scalar_lea.hbm %s4109_s21, 128 }
0x1813   :  { %p3360_p12 = scmp.ne.s32.totalorder %s4109_s21, %s3359_s6  ;;  %p3363_p13 = scmp.lt.u32.totalorder %s3359_s6, %s4109_s21 }
0x1815   :  { %p3365_p0 = pnand %p3363_p13, %p3360_p12 }
0x1817   :  { %3368 = shalt.err (!%p3365_p0)
}
0x1818   :  { %2638 = dma.vmem_to_hbm [thread:$0]  %s2636_s0, 128, %s4109_s21, [#allocation8]  }
0x1819   :  { %s3369_s24 = scalar_lea.vmem %s2646_s2, 128  ;;  %p3374_p2 = scmp.lt.s32.totalorder %s2646_s2, %s2646_s2 }
0x181a   :  { %p3370_p1 = scmp.ne.s32.totalorder %s2646_s2, %s3369_s24  ;;  %p3375_p3 = scmp.lt.s32.totalorder %s3369_s24, %s3369_s24 }
0x181c   :  { %p3376_p4 = por %p3375_p3, %p3374_p2 }
0x181e   :  { %p3377_p5 = pnand %p3376_p4, %p3370_p1 }
0x1820   :  { %3380 = shalt.err (!%p3377_p5)
}
0x1821   :  { %s3381_s11 = scalar_lea.hbm %s4110_s22, 128 }
0x1822   :  { %p3382_p6 = scmp.ne.s32.totalorder %s4110_s22, %s3381_s11  ;;  %p3385_p7 = scmp.lt.u32.totalorder %s3381_s11, %s4110_s22 }
0x1824   :  { %p3387_p8 = pnand %p3385_p7, %p3382_p6 }
0x1826   :  { %3390 = shalt.err (!%p3387_p8)
}
0x1827   :  { %2648 = dma.vmem_to_hbm [thread:$0]  %s2646_s2, 128, %s4110_s22, [#allocation8]  }
0x1828   :  { %3393 = dma.done.wait [#allocation4], 128  }
0x1829   :  { %3394 = vsyncadd [#allocation4], 4294967168 }
0x182a   :  { %3395 = dma.done.wait [#allocation8], 256  }
0x182b   :  { %3396 = vsyncadd [#allocation8], 4294967040 }
0x182c   :  { %3397 = dma.done.wait [#allocation11], 128  }
0x182d   :  { %3398 = vsyncadd [#allocation11], 4294967168 }
0x182e   :  { %2671 = vsyncpa [#allocation4], 1 }
0x182f   :  { %2672 = vsyncpa [#allocation8], 1 }
0x1830   :  { %2673 = vsyncpa [#allocation11], 1 }
0x1831   :  { %2674 = vsyncpa [#allocation5], 1 }

</bundles_post_ra>
